<compile_context>
chip_gen: v6e
topology: v6e:2x2x1
jax: 0.10.0
libtpu: 0.0.40
codegen_flags: <defaults>
</compile_context>

<pallas_src>
import jax
import jax.numpy as jnp
from jax.experimental import pallas as pl
from jax.experimental.pallas import tpu as pltpu

# channel plan of the PyTorch module
_ENC = [(3, 16), (16, 8), (8, 4)]   # Conv2d(Cin, Cout, 3, padding=1) + ReLU + MaxPool2d(2, 2)
_DEC = [(4, 8), (8, 16), (16, 3)]   # ConvTranspose2d(Cin, Cout, 3, stride=2, pad=1, out_pad=1) + ReLU

_MM_DTYPE = jnp.bfloat16            # MXU input dtype for conv/deconv matmuls (f32 accumulation)


# ---------------- one-time weight repacking (outside jit) ----------------

def _enc_tap_matrix(w_kh, W, Cout, Cin):
    """((W+2)*Cin, W*Cout) tap matrix for one kh slice of a 3x3 conv (padding=1).
    Output columns are parity-grouped: out col x -> lane (x%2)*(W//2)*Cout + (x//2)*Cout,
    so the 2x2 max-pool's column half is a max of two contiguous lane slices."""
    Q = (W // 2) * Cout
    stacked = jnp.transpose(w_kh, (2, 1, 0)).reshape(3 * Cin, Cout)   # row = kw*Cin + ci
    B = jnp.zeros(((W + 2) * Cin, W * Cout), jnp.float32)
    for j in range(W):
        col = (j % 2) * Q + (j // 2) * Cout
        B = B.at[j * Cin:(j + 3) * Cin, col:col + Cout].set(stacked)
    return B


def _dec_tap_matrix(wk, W, Cin, Cout):
    """((W+1)*Cin, 2*W*Cout) tap matrix for one kh slice of ConvTranspose2d(3, stride=2, pad=1,
    out_pad=1); wk = weight[:, :, kh, :] in PyTorch layout (Cin, Cout, kw).
    Output column ow=2j   <- x[., j]   * wk[:, :, 1]
    Output column ow=2j+1 <- x[., j]   * wk[:, :, 2]  +  x[., j+1] * wk[:, :, 0]."""
    M = jnp.zeros(((W + 1) * Cin, 2 * W * Cout), jnp.float32)
    for j in range(W):
        M = M.at[j * Cin:(j + 1) * Cin, (2 * j) * Cout:(2 * j + 1) * Cout].set(wk[:, :, 1])
        M = M.at[j * Cin:(j + 1) * Cin, (2 * j + 1) * Cout:(2 * j + 2) * Cout].set(wk[:, :, 2])
        M = M.at[(j + 1) * Cin:(j + 2) * Cin, (2 * j + 1) * Cout:(2 * j + 2) * Cout].set(wk[:, :, 0])
    return M


def prepare_params(params, H, W):
    """One-time repack of PyTorch-layout parameters into the block-structured bf16 matmul
    weights used by the fused kernel.  Hoisted out of the jitted forward."""
    packed = []
    h, w = H, W
    for i, (cin, cout) in enumerate(_ENC, start=1):
        wt, b = params[f"enc{i}_w"], params[f"enc{i}_b"]
        taps = jnp.stack([_enc_tap_matrix(wt[:, :, kh, :], w, cout, cin) for kh in range(3)])
        bias = jnp.tile(b.astype(jnp.float32), w // 2).reshape(1, (w // 2) * cout)
        packed += [taps.astype(_MM_DTYPE), bias]
        h, w = h // 2, w // 2
    for i, (cin, cout) in enumerate(_DEC, start=1):
        wt, b = params[f"dec{i}_w"], params[f"dec{i}_b"]
        # stack order: [BE (kh=1, even out rows), BO0 (kh=2, odd rows, x[i]), BO1 (kh=0, odd rows, x[i+1])]
        taps = jnp.stack([_dec_tap_matrix(wt[:, :, kh, :], w, cin, cout) for kh in (1, 2, 0)])
        bias = jnp.tile(b.astype(jnp.float32), 2 * w).reshape(1, 2 * w * cout)
        packed += [taps.astype(_MM_DTYPE), bias]
        h, w = 2 * h, 2 * w
    return tuple(packed)


# ---------------- in-kernel helpers (row-parity via exact 0/1 matmuls) ----------------

def _even_odd_select(x):
    """Return (x[0::2], x[1::2]) via exact 0/1 selection matmuls (no strided slices/reshapes)."""
    n = x.shape[0]
    m = n // 2
    r = jax.lax.broadcasted_iota(jnp.int32, (m, n), 0)
    c = jax.lax.broadcasted_iota(jnp.int32, (m, n), 1)
    se = (c == 2 * r).astype(jnp.float32)
    so = (c == 2 * r + 1).astype(jnp.float32)
    return (jnp.dot(se, x, preferred_element_type=jnp.float32),
            jnp.dot(so, x, preferred_element_type=jnp.float32))


def _interleave_rows(even, odd):
    """Return y with y[2r] = even[r], y[2r+1] = odd[r] via 0/1 placement matmuls."""
    m = even.shape[0]
    r = jax.lax.broadcasted_iota(jnp.int32, (2 * m, m), 0)
    c = jax.lax.broadcasted_iota(jnp.int32, (2 * m, m), 1)
    te = (r == 2 * c).astype(jnp.float32)
    to = (r == 2 * c + 1).astype(jnp.float32)
    return (jnp.dot(te, even, preferred_element_type=jnp.float32) +
            jnp.dot(to, odd, preferred_element_type=jnp.float32))


# ---------------- fused kernel ----------------

def _make_fused_kernel(H, W):
    enc_shapes = []
    h, w = H, W
    for cin, cout in _ENC:
        enc_shapes.append((h, w, cin, cout))
        h, w = h // 2, w // 2
    dec_shapes = []
    for cin, cout in _DEC:
        dec_shapes.append((h, w, cin, cout))
        h, w = 2 * h, 2 * w

    def kernel(x_ref,
               we1, be1, we2, be2, we3, be3,
               wd1, bd1, wd2, bd2, wd3, bd3,
               o_ref,
               p1, p2, p3, q1, q2, q3):
        enc_w = (we1, we2, we3)
        enc_b = (be1, be2, be3)
        enc_p = (p1, p2, p3)
        dec_w = (wd1, wd2, wd3)
        dec_b = (bd1, bd2, bd3)
        dec_p = (q1, q2, q3)

        a = x_ref[0]                                        # (H, W*3) f32

        # ---- encoder: Conv3x3(pad=1) + bias + ReLU + MaxPool2x2, all in VMEM ----
        for s, (h, w, cin, cout) in enumerate(enc_shapes):
            pad = enc_p[s]                                  # (h+2, (w+2)*cin) f32 scratch
            pad[...] = jnp.zeros_like(pad)                  # in-kernel spatial padding
            pad[1:h + 1, cin:(w + 1) * cin] = a.astype(pad.dtype)
            wq = (w // 2) * cout
            conv = (jnp.dot(pad[0:h, :].astype(_MM_DTYPE), enc_w[s][0],
                            preferred_element_type=jnp.float32) +
                    jnp.dot(pad[1:h + 1, :].astype(_MM_DTYPE), enc_w[s][1],
                            preferred_element_type=jnp.float32) +
                    jnp.dot(pad[2:h + 2, :].astype(_MM_DTYPE), enc_w[s][2],
                            preferred_element_type=jnp.float32))   # (h, w*cout), parity-grouped cols
            lane = jnp.maximum(conv[:, 0:wq], conv[:, wq:2 * wq])   # column half of the 2x2 pool
            ev, od = _even_odd_select(lane)                         # row half of the 2x2 pool
            a = jnp.maximum(jnp.maximum(ev, od) + enc_b[s][...], 0.0)   # (h//2, (w//2)*cout)

        # ---- decoder: ConvTranspose3x3(stride=2, pad=1, out_pad=1) + bias + ReLU ----
        for s, (h, w, cin, cout) in enumerate(dec_shapes):
            pad = dec_p[s]                                  # (h+1, (w+1)*cin) f32 scratch
            pad[...] = jnp.zeros_like(pad)                  # one zero row bottom / one zero pixel right
            pad[0:h, 0:w * cin] = a.astype(pad.dtype)
            x0 = pad[0:h, :].astype(_MM_DTYPE)
            x1 = pad[1:h + 1, :].astype(_MM_DTYPE)
            even = jnp.dot(x0, dec_w[s][0], preferred_element_type=jnp.float32)
            odd = (jnp.dot(x0, dec_w[s][1], preferred_element_type=jnp.float32) +
                   jnp.dot(x1, dec_w[s][2], preferred_element_type=jnp.float32))
            even = jnp.maximum(even + dec_b[s][...], 0.0)
            odd = jnp.maximum(odd + dec_b[s][...], 0.0)
            a = _interleave_rows(even, odd)                 # (2h, 2w*cout)

        o_ref[0] = a.astype(o_ref.dtype)

    return kernel, enc_shapes, dec_shapes


# ---------------- forward wrapper ----------------

def autoencoder_forward(packed, x_nchw):
    """packed: output of prepare_params (built once, outside jit).
    x_nchw: (N, 3, H, W) float32 with H, W divisible by 8.  Returns (N, 3, H, W)."""
    N, C, H, W = x_nchw.shape
    assert C == 3 and H % 8 == 0 and W % 8 == 0
    x = jnp.transpose(x_nchw, (0, 2, 3, 1)).astype(jnp.float32).reshape(N, H, W * C)

    kernel, enc_shapes, dec_shapes = _make_fused_kernel(H, W)

    in_specs = [pl.BlockSpec((1, H, W * C), lambda n: (n, 0, 0))]
    for arr in packed:
        if arr.ndim == 3:
            in_specs.append(pl.BlockSpec(arr.shape, lambda n: (0, 0, 0)))
        else:
            in_specs.append(pl.BlockSpec(arr.shape, lambda n: (0, 0)))

    scratch = []
    for (h, w, cin, _cout) in enc_shapes:
        scratch.append(pltpu.VMEM((h + 2, (w + 2) * cin), jnp.float32))
    for (h, w, cin, _cout) in dec_shapes:
        scratch.append(pltpu.VMEM((h + 1, (w + 1) * cin), jnp.float32))

    out = pl.pallas_call(
        kernel,
        out_shape=jax.ShapeDtypeStruct((N, H, W * 3), jnp.float32),
        grid=(N,),
        in_specs=in_specs,
        out_specs=pl.BlockSpec((1, H, W * 3), lambda n: (n, 0, 0)),
        scratch_shapes=scratch,
        compiler_params=pltpu.CompilerParams(
            dimension_semantics=("parallel",),
            vmem_limit_bytes=32 * 1024 * 1024),
    )(x, *packed)

    return jnp.transpose(out.reshape(N, H, W, 3), (0, 3, 1, 2))   # NHWC -> NCHW


# ---------------- parameters ----------------

def init_params(key):
    def normal(k, shape, scale=0.1):
        return scale * jax.random.normal(k, shape, dtype=jnp.float32)
    ks = jax.random.split(key, 12)
    return {
        # encoder Conv2d weights: (Cout, Cin, 3, 3)
        "enc1_w": normal(ks[0], (16, 3, 3, 3)),  "enc1_b": normal(ks[1], (16,)),
        "enc2_w": normal(ks[2], (8, 16, 3, 3)),  "enc2_b": normal(ks[3], (8,)),
        "enc3_w": normal(ks[4], (4, 8, 3, 3)),   "enc3_b": normal(ks[5], (4,)),
        # decoder ConvTranspose2d weights: (Cin, Cout, 3, 3)
        "dec1_w": normal(ks[6], (4, 8, 3, 3)),   "dec1_b": normal(ks[7], (8,)),
        "dec2_w": normal(ks[8], (8, 16, 3, 3)),  "dec2_b": normal(ks[9], (16,)),
        "dec3_w": normal(ks[10], (16, 3, 3, 3)), "dec3_b": normal(ks[11], (3,)),
    }


# ---------------- pure-XLA reference (correctness check) ----------------

def reference_forward(params, x_nchw):
    x = jnp.transpose(x_nchw, (0, 2, 3, 1)).astype(jnp.float32)

    def conv(x, w, b):
        y = jax.lax.conv_general_dilated(
            x, w, window_strides=(1, 1), padding=((1, 1), (1, 1)),
            dimension_numbers=("NHWC", "OIHW", "NHWC"),
            precision=jax.lax.Precision.HIGHEST)
        return jnp.maximum(y + b, 0.0)

    def pool(x):
        return jax.lax.reduce_window(x, -jnp.inf, jax.lax.max,
                                     (1, 2, 2, 1), (1, 2, 2, 1), "VALID")

    def deconv(x, w, b):
        wc = jnp.transpose(w[:, :, ::-1, ::-1], (1, 0, 2, 3))
        y = jax.lax.conv_general_dilated(
            x, wc, window_strides=(1, 1), padding=((1, 2), (1, 2)),
            lhs_dilation=(2, 2),
            dimension_numbers=("NHWC", "OIHW", "NHWC"),
            precision=jax.lax.Precision.HIGHEST)
        return jnp.maximum(y + b, 0.0)

    x = pool(conv(x, params["enc1_w"], params["enc1_b"]))
    x = pool(conv(x, params["enc2_w"], params["enc2_b"]))
    x = pool(conv(x, params["enc3_w"], params["enc3_b"]))
    x = deconv(x, params["dec1_w"], params["dec1_b"])
    x = deconv(x, params["dec2_w"], params["dec2_b"])
    x = deconv(x, params["dec3_w"], params["dec3_b"])
    return jnp.transpose(x, (0, 3, 1, 2))


if __name__ == "__main__":
    key = jax.random.PRNGKey(0)
    k_params, k_x = jax.random.split(key)
    params = init_params(k_params)
    x = jax.random.normal(k_x, (2, 3, 16, 16), dtype=jnp.float32)   # NCHW like PyTorch

    packed = prepare_params(params, H=16, W=16)   # one-time repack, hoisted out of jit
    fwd = jax.jit(autoencoder_forward)
    y = fwd(packed, x)
    jax.block_until_ready(y)

    assert y.shape == (2, 3, 16, 16), y.shape
    assert bool(jnp.all(jnp.isfinite(y))) and bool(jnp.all(y >= 0.0))   # final ReLU

    y_ref = reference_forward(params, x)
    err = float(jnp.max(jnp.abs(y - y_ref)))
    # bf16 MXU matmul inputs (f32 accumulation) leave ~1e-3-scale differences vs the
    # Precision.HIGHEST f32 reference; 2e-2 gives comfortable margin.
    assert err < 2e-2, f"Pallas output mismatch vs XLA reference: max abs err = {err}"

    print("KERNEL_OK")
</pallas_src>

<mosaic_0001>
module attributes {stable_mosaic.version = 11 : i64} {
  func.func @kernel(%arg0: i32, %arg1: memref<1x16x48xf32, #tpu.memory_space<vmem>>, %arg2: memref<3x54x256xbf16, #tpu.memory_space<vmem>>, %arg3: memref<1x128xf32, #tpu.memory_space<vmem>>, %arg4: memref<3x160x64xbf16, #tpu.memory_space<vmem>>, %arg5: memref<1x32xf32, #tpu.memory_space<vmem>>, %arg6: memref<3x48x16xbf16, #tpu.memory_space<vmem>>, %arg7: memref<1x8xf32, #tpu.memory_space<vmem>>, %arg8: memref<3x12x32xbf16, #tpu.memory_space<vmem>>, %arg9: memref<1x32xf32, #tpu.memory_space<vmem>>, %arg10: memref<3x40x128xbf16, #tpu.memory_space<vmem>>, %arg11: memref<1x128xf32, #tpu.memory_space<vmem>>, %arg12: memref<3x144x48xbf16, #tpu.memory_space<vmem>>, %arg13: memref<1x48xf32, #tpu.memory_space<vmem>>, %arg14: memref<1x16x48xf32, #tpu.memory_space<vmem>>, %arg15: memref<18x54xf32, #tpu.memory_space<vmem>>, %arg16: memref<10x160xf32, #tpu.memory_space<vmem>>, %arg17: memref<6x48xf32, #tpu.memory_space<vmem>>, %arg18: memref<3x12xf32, #tpu.memory_space<vmem>>, %arg19: memref<5x40xf32, #tpu.memory_space<vmem>>, %arg20: memref<9x144xf32, #tpu.memory_space<vmem>>) attributes {dimension_semantics = [#tpu.dimension_semantics<parallel>], iteration_bounds = array<i64: 2>, scalar_prefetch = 0 : i64, scratch_operands = 6 : i64, tpu.core_type = #tpu.core_type<tc>, window_params = [{transform_indices = @transform_0, window_bounds = array<i64: 1, 16, 48>}, {pipeline_mode = #tpu.pipeline_mode<synchronous>, transform_indices = @transform_1, window_bounds = array<i64: 3, 54, 256>}, {pipeline_mode = #tpu.pipeline_mode<synchronous>, transform_indices = @transform_2, window_bounds = array<i64: 1, 128>}, {pipeline_mode = #tpu.pipeline_mode<synchronous>, transform_indices = @transform_3, window_bounds = array<i64: 3, 160, 64>}, {pipeline_mode = #tpu.pipeline_mode<synchronous>, transform_indices = @transform_4, window_bounds = array<i64: 1, 32>}, {pipeline_mode = #tpu.pipeline_mode<synchronous>, transform_indices = @transform_5, window_bounds = array<i64: 3, 48, 16>}, {pipeline_mode = #tpu.pipeline_mode<synchronous>, transform_indices = @transform_6, window_bounds = array<i64: 1, 8>}, {pipeline_mode = #tpu.pipeline_mode<synchronous>, transform_indices = @transform_7, window_bounds = array<i64: 3, 12, 32>}, {pipeline_mode = #tpu.pipeline_mode<synchronous>, transform_indices = @transform_8, window_bounds = array<i64: 1, 32>}, {pipeline_mode = #tpu.pipeline_mode<synchronous>, transform_indices = @transform_9, window_bounds = array<i64: 3, 40, 128>}, {pipeline_mode = #tpu.pipeline_mode<synchronous>, transform_indices = @transform_10, window_bounds = array<i64: 1, 128>}, {pipeline_mode = #tpu.pipeline_mode<synchronous>, transform_indices = @transform_11, window_bounds = array<i64: 3, 144, 48>}, {pipeline_mode = #tpu.pipeline_mode<synchronous>, transform_indices = @transform_12, window_bounds = array<i64: 1, 48>}, {transform_indices = @transform_13, window_bounds = array<i64: 1, 16, 48>}]} {
    %c0 = arith.constant 0 : index
    %c0_0 = arith.constant 0 : index
    %c0_1 = arith.constant 0 : index
    %0 = vector.load %arg1[%c0, %c0_0, %c0_1] : memref<1x16x48xf32, #tpu.memory_space<vmem>>, vector<1x16x48xf32>
    %1 = vector.shape_cast %0 : vector<1x16x48xf32> to vector<16x48xf32>
    %cst = arith.constant 0.000000e+00 : f32
    %2 = vector.broadcast %cst : f32 to vector<18x54xf32>
    %c0_2 = arith.constant 0 : index
    %c0_3 = arith.constant 0 : index
    %3 = vector.load %arg15[%c0_2, %c0_3] : memref<18x54xf32, #tpu.memory_space<vmem>>, vector<18x54xf32>
    tpu.vector_store %arg15[%c0_2, %c0_3], %2 {strides = array<i32>} : memref<18x54xf32, #tpu.memory_space<vmem>>, vector<18x54xf32>,
    %c1 = arith.constant 1 : index
    %c3 = arith.constant 3 : index
    %4 = vector.load %arg15[%c1, %c3] : memref<18x54xf32, #tpu.memory_space<vmem>>, vector<16x48xf32>
    tpu.vector_store %arg15[%c1, %c3], %1 {strides = array<i32>} : memref<18x54xf32, #tpu.memory_space<vmem>>, vector<16x48xf32>,
    %c0_4 = arith.constant 0 : index
    %c0_5 = arith.constant 0 : index
    %5 = vector.load %arg15[%c0_4, %c0_5] : memref<18x54xf32, #tpu.memory_space<vmem>>, vector<16x54xf32>
    %6 = arith.truncf %5 : vector<16x54xf32> to vector<16x54xbf16>
    %c0_6 = arith.constant 0 : index
    %c0_7 = arith.constant 0 : index
    %c0_8 = arith.constant 0 : index
    %7 = vector.load %arg2[%c0_6, %c0_7, %c0_8] : memref<3x54x256xbf16, #tpu.memory_space<vmem>>, vector<1x54x256xbf16>
    %8 = vector.shape_cast %7 : vector<1x54x256xbf16> to vector<54x256xbf16>
    %cst_9 = arith.constant dense<0.000000e+00> : vector<16x256xf32>
    %9 = tpu.matmul %6, %8, %cst_9 {dimension_numbers = #tpu.dot_dimension_numbers<[1], [0], [0], [1], [0, 0, 1, 1], [], []>} : vector<16x54xbf16>, vector<54x256xbf16>, vector<16x256xf32> -> vector<16x256xf32>
    %c1_10 = arith.constant 1 : index
    %c0_11 = arith.constant 0 : index
    %10 = vector.load %arg15[%c1_10, %c0_11] : memref<18x54xf32, #tpu.memory_space<vmem>>, vector<16x54xf32>
    %11 = arith.truncf %10 : vector<16x54xf32> to vector<16x54xbf16>
    %c1_12 = arith.constant 1 : index
    %c0_13 = arith.constant 0 : index
    %c0_14 = arith.constant 0 : index
    %12 = vector.load %arg2[%c1_12, %c0_13, %c0_14] : memref<3x54x256xbf16, #tpu.memory_space<vmem>>, vector<1x54x256xbf16>
    %13 = vector.shape_cast %12 : vector<1x54x256xbf16> to vector<54x256xbf16>
    %cst_15 = arith.constant dense<0.000000e+00> : vector<16x256xf32>
    %14 = tpu.matmul %11, %13, %cst_15 {dimension_numbers = #tpu.dot_dimension_numbers<[1], [0], [0], [1], [0, 0, 1, 1], [], []>} : vector<16x54xbf16>, vector<54x256xbf16>, vector<16x256xf32> -> vector<16x256xf32>
    %15 = arith.addf %9, %14 : vector<16x256xf32>
    %c2 = arith.constant 2 : index
    %c0_16 = arith.constant 0 : index
    %16 = vector.load %arg15[%c2, %c0_16] : memref<18x54xf32, #tpu.memory_space<vmem>>, vector<16x54xf32>
    %17 = arith.truncf %16 : vector<16x54xf32> to vector<16x54xbf16>
    %c2_17 = arith.constant 2 : index
    %c0_18 = arith.constant 0 : index
    %c0_19 = arith.constant 0 : index
    %18 = vector.load %arg2[%c2_17, %c0_18, %c0_19] : memref<3x54x256xbf16, #tpu.memory_space<vmem>>, vector<1x54x256xbf16>
    %19 = vector.shape_cast %18 : vector<1x54x256xbf16> to vector<54x256xbf16>
    %cst_20 = arith.constant dense<0.000000e+00> : vector<16x256xf32>
    %20 = tpu.matmul %17, %19, %cst_20 {dimension_numbers = #tpu.dot_dimension_numbers<[1], [0], [0], [1], [0, 0, 1, 1], [], []>} : vector<16x54xbf16>, vector<54x256xbf16>, vector<16x256xf32> -> vector<16x256xf32>
    %21 = arith.addf %15, %20 : vector<16x256xf32>
    %22 = vector.extract_strided_slice %21 {offsets = [0, 0], sizes = [16, 128], strides = [1, 1]} : vector<16x256xf32> to vector<16x128xf32>
    %23 = vector.extract_strided_slice %21 {offsets = [0, 128], sizes = [16, 128], strides = [1, 1]} : vector<16x256xf32> to vector<16x128xf32>
    %24 = arith.maximumf %22, %23 : vector<16x128xf32>
    %25 = tpu.iota {dimensions = array<i32: 0>} : vector<8x16xi32>
    %26 = tpu.iota {dimensions = array<i32: 1>} : vector<8x16xi32>
    %c2_i32 = arith.constant 2 : i32
    %27 = vector.broadcast %c2_i32 : i32 to vector<8x16xi32>
    %28 = arith.muli %27, %25 : vector<8x16xi32>
    %29 = arith.cmpi eq, %26, %28 : vector<8x16xi32>
    %30 = arith.extui %29 : vector<8x16xi1> to vector<8x16xi32>
    %31 = arith.sitofp %30 : vector<8x16xi32> to vector<8x16xf32>
    %c2_i32_21 = arith.constant 2 : i32
    %32 = vector.broadcast %c2_i32_21 : i32 to vector<8x16xi32>
    %33 = arith.muli %32, %25 : vector<8x16xi32>
    %c1_i32 = arith.constant 1 : i32
    %34 = vector.broadcast %c1_i32 : i32 to vector<8x16xi32>
    %35 = arith.addi %33, %34 : vector<8x16xi32>
    %36 = arith.cmpi eq, %26, %35 : vector<8x16xi32>
    %37 = arith.extui %36 : vector<8x16xi1> to vector<8x16xi32>
    %38 = arith.sitofp %37 : vector<8x16xi32> to vector<8x16xf32>
    %cst_22 = arith.constant dense<0.000000e+00> : vector<8x128xf32>
    %39 = tpu.matmul %31, %24, %cst_22 {dimension_numbers = #tpu.dot_dimension_numbers<[1], [0], [0], [1], [0, 0, 1, 1], [], []>} : vector<8x16xf32>, vector<16x128xf32>, vector<8x128xf32> -> vector<8x128xf32>
    %cst_23 = arith.constant dense<0.000000e+00> : vector<8x128xf32>
    %40 = tpu.matmul %38, %24, %cst_23 {dimension_numbers = #tpu.dot_dimension_numbers<[1], [0], [0], [1], [0, 0, 1, 1], [], []>} : vector<8x16xf32>, vector<16x128xf32>, vector<8x128xf32> -> vector<8x128xf32>
    %41 = arith.maximumf %39, %40 : vector<8x128xf32>
    %c0_24 = arith.constant 0 : index
    %c0_25 = arith.constant 0 : index
    %42 = vector.load %arg3[%c0_24, %c0_25] : memref<1x128xf32, #tpu.memory_space<vmem>>, vector<1x128xf32>
    %43 = vector.broadcast %42 : vector<1x128xf32> to vector<8x128xf32>
    %44 = arith.addf %41, %43 : vector<8x128xf32>
    %cst_26 = arith.constant 0.000000e+00 : f32
    %45 = vector.broadcast %cst_26 : f32 to vector<8x128xf32>
    %46 = arith.maximumf %44, %45 : vector<8x128xf32>
    %cst_27 = arith.constant 0.000000e+00 : f32
    %47 = vector.broadcast %cst_27 : f32 to vector<10x160xf32>
    %c0_28 = arith.constant 0 : index
    %c0_29 = arith.constant 0 : index
    %48 = vector.load %arg16[%c0_28, %c0_29] : memref<10x160xf32, #tpu.memory_space<vmem>>, vector<10x160xf32>
    tpu.vector_store %arg16[%c0_28, %c0_29], %47 {strides = array<i32>} : memref<10x160xf32, #tpu.memory_space<vmem>>, vector<10x160xf32>,
    %c1_30 = arith.constant 1 : index
    %c16 = arith.constant 16 : index
    %49 = vector.load %arg16[%c1_30, %c16] : memref<10x160xf32, #tpu.memory_space<vmem>>, vector<8x128xf32>
    tpu.vector_store %arg16[%c1_30, %c16], %46 {strides = array<i32>} : memref<10x160xf32, #tpu.memory_space<vmem>>, vector<8x128xf32>,
    %c0_31 = arith.constant 0 : index
    %c0_32 = arith.constant 0 : index
    %50 = vector.load %arg16[%c0_31, %c0_32] : memref<10x160xf32, #tpu.memory_space<vmem>>, vector<8x160xf32>
    %51 = arith.truncf %50 : vector<8x160xf32> to vector<8x160xbf16>
    %c0_33 = arith.constant 0 : index
    %c0_34 = arith.constant 0 : index
    %c0_35 = arith.constant 0 : index
    %52 = vector.load %arg4[%c0_33, %c0_34, %c0_35] : memref<3x160x64xbf16, #tpu.memory_space<vmem>>, vector<1x160x64xbf16>
    %53 = vector.shape_cast %52 : vector<1x160x64xbf16> to vector<160x64xbf16>
    %cst_36 = arith.constant dense<0.000000e+00> : vector<8x64xf32>
    %54 = tpu.matmul %51, %53, %cst_36 {dimension_numbers = #tpu.dot_dimension_numbers<[1], [0], [0], [1], [0, 0, 1, 1], [], []>} : vector<8x160xbf16>, vector<160x64xbf16>, vector<8x64xf32> -> vector<8x64xf32>
    %c1_37 = arith.constant 1 : index
    %c0_38 = arith.constant 0 : index
    %55 = vector.load %arg16[%c1_37, %c0_38] : memref<10x160xf32, #tpu.memory_space<vmem>>, vector<8x160xf32>
    %56 = arith.truncf %55 : vector<8x160xf32> to vector<8x160xbf16>
    %c1_39 = arith.constant 1 : index
    %c0_40 = arith.constant 0 : index
    %c0_41 = arith.constant 0 : index
    %57 = vector.load %arg4[%c1_39, %c0_40, %c0_41] : memref<3x160x64xbf16, #tpu.memory_space<vmem>>, vector<1x160x64xbf16>
    %58 = vector.shape_cast %57 : vector<1x160x64xbf16> to vector<160x64xbf16>
    %cst_42 = arith.constant dense<0.000000e+00> : vector<8x64xf32>
    %59 = tpu.matmul %56, %58, %cst_42 {dimension_numbers = #tpu.dot_dimension_numbers<[1], [0], [0], [1], [0, 0, 1, 1], [], []>} : vector<8x160xbf16>, vector<160x64xbf16>, vector<8x64xf32> -> vector<8x64xf32>
    %60 = arith.addf %54, %59 : vector<8x64xf32>
    %c2_43 = arith.constant 2 : index
    %c0_44 = arith.constant 0 : index
    %61 = vector.load %arg16[%c2_43, %c0_44] : memref<10x160xf32, #tpu.memory_space<vmem>>, vector<8x160xf32>
    %62 = arith.truncf %61 : vector<8x160xf32> to vector<8x160xbf16>
    %c2_45 = arith.constant 2 : index
    %c0_46 = arith.constant 0 : index
    %c0_47 = arith.constant 0 : index
    %63 = vector.load %arg4[%c2_45, %c0_46, %c0_47] : memref<3x160x64xbf16, #tpu.memory_space<vmem>>, vector<1x160x64xbf16>
    %64 = vector.shape_cast %63 : vector<1x160x64xbf16> to vector<160x64xbf16>
    %cst_48 = arith.constant dense<0.000000e+00> : vector<8x64xf32>
    %65 = tpu.matmul %62, %64, %cst_48 {dimension_numbers = #tpu.dot_dimension_numbers<[1], [0], [0], [1], [0, 0, 1, 1], [], []>} : vector<8x160xbf16>, vector<160x64xbf16>, vector<8x64xf32> -> vector<8x64xf32>
    %66 = arith.addf %60, %65 : vector<8x64xf32>
    %67 = vector.extract_strided_slice %66 {offsets = [0, 0], sizes = [8, 32], strides = [1, 1]} : vector<8x64xf32> to vector<8x32xf32>
    %68 = vector.extract_strided_slice %66 {offsets = [0, 32], sizes = [8, 32], strides = [1, 1]} : vector<8x64xf32> to vector<8x32xf32>
    %69 = arith.maximumf %67, %68 : vector<8x32xf32>
    %70 = tpu.iota {dimensions = array<i32: 0>} : vector<4x8xi32>
    %71 = tpu.iota {dimensions = array<i32: 1>} : vector<4x8xi32>
    %c2_i32_49 = arith.constant 2 : i32
    %72 = vector.broadcast %c2_i32_49 : i32 to vector<4x8xi32>
    %73 = arith.muli %72, %70 : vector<4x8xi32>
    %74 = arith.cmpi eq, %71, %73 : vector<4x8xi32>
    %75 = arith.extui %74 : vector<4x8xi1> to vector<4x8xi32>
    %76 = arith.sitofp %75 : vector<4x8xi32> to vector<4x8xf32>
    %c2_i32_50 = arith.constant 2 : i32
    %77 = vector.broadcast %c2_i32_50 : i32 to vector<4x8xi32>
    %78 = arith.muli %77, %70 : vector<4x8xi32>
    %c1_i32_51 = arith.constant 1 : i32
    %79 = vector.broadcast %c1_i32_51 : i32 to vector<4x8xi32>
    %80 = arith.addi %78, %79 : vector<4x8xi32>
    %81 = arith.cmpi eq, %71, %80 : vector<4x8xi32>
    %82 = arith.extui %81 : vector<4x8xi1> to vector<4x8xi32>
    %83 = arith.sitofp %82 : vector<4x8xi32> to vector<4x8xf32>
    %cst_52 = arith.constant dense<0.000000e+00> : vector<4x32xf32>
    %84 = tpu.matmul %76, %69, %cst_52 {dimension_numbers = #tpu.dot_dimension_numbers<[1], [0], [0], [1], [0, 0, 1, 1], [], []>} : vector<4x8xf32>, vector<8x32xf32>, vector<4x32xf32> -> vector<4x32xf32>
    %cst_53 = arith.constant dense<0.000000e+00> : vector<4x32xf32>
    %85 = tpu.matmul %83, %69, %cst_53 {dimension_numbers = #tpu.dot_dimension_numbers<[1], [0], [0], [1], [0, 0, 1, 1], [], []>} : vector<4x8xf32>, vector<8x32xf32>, vector<4x32xf32> -> vector<4x32xf32>
    %86 = arith.maximumf %84, %85 : vector<4x32xf32>
    %c0_54 = arith.constant 0 : index
    %c0_55 = arith.constant 0 : index
    %87 = vector.load %arg5[%c0_54, %c0_55] : memref<1x32xf32, #tpu.memory_space<vmem>>, vector<1x32xf32>
    %88 = vector.broadcast %87 : vector<1x32xf32> to vector<4x32xf32>
    %89 = arith.addf %86, %88 : vector<4x32xf32>
    %cst_56 = arith.constant 0.000000e+00 : f32
    %90 = vector.broadcast %cst_56 : f32 to vector<4x32xf32>
    %91 = arith.maximumf %89, %90 : vector<4x32xf32>
    %cst_57 = arith.constant 0.000000e+00 : f32
    %92 = vector.broadcast %cst_57 : f32 to vector<6x48xf32>
    %c0_58 = arith.constant 0 : index
    %c0_59 = arith.constant 0 : index
    %93 = vector.load %arg17[%c0_58, %c0_59] : memref<6x48xf32, #tpu.memory_space<vmem>>, vector<6x48xf32>
    tpu.vector_store %arg17[%c0_58, %c0_59], %92 {strides = array<i32>} : memref<6x48xf32, #tpu.memory_space<vmem>>, vector<6x48xf32>,
    %c1_60 = arith.constant 1 : index
    %c8 = arith.constant 8 : index
    %94 = vector.load %arg17[%c1_60, %c8] : memref<6x48xf32, #tpu.memory_space<vmem>>, vector<4x32xf32>
    tpu.vector_store %arg17[%c1_60, %c8], %91 {strides = array<i32>} : memref<6x48xf32, #tpu.memory_space<vmem>>, vector<4x32xf32>,
    %c0_61 = arith.constant 0 : index
    %c0_62 = arith.constant 0 : index
    %95 = vector.load %arg17[%c0_61, %c0_62] : memref<6x48xf32, #tpu.memory_space<vmem>>, vector<4x48xf32>
    %96 = arith.truncf %95 : vector<4x48xf32> to vector<4x48xbf16>
    %c0_63 = arith.constant 0 : index
    %c0_64 = arith.constant 0 : index
    %c0_65 = arith.constant 0 : index
    %97 = vector.load %arg6[%c0_63, %c0_64, %c0_65] : memref<3x48x16xbf16, #tpu.memory_space<vmem>>, vector<1x48x16xbf16>
    %98 = vector.shape_cast %97 : vector<1x48x16xbf16> to vector<48x16xbf16>
    %cst_66 = arith.constant dense<0.000000e+00> : vector<4x16xf32>
    %99 = tpu.matmul %96, %98, %cst_66 {dimension_numbers = #tpu.dot_dimension_numbers<[1], [0], [0], [1], [0, 0, 1, 1], [], []>} : vector<4x48xbf16>, vector<48x16xbf16>, vector<4x16xf32> -> vector<4x16xf32>
    %c1_67 = arith.constant 1 : index
    %c0_68 = arith.constant 0 : index
    %100 = vector.load %arg17[%c1_67, %c0_68] : memref<6x48xf32, #tpu.memory_space<vmem>>, vector<4x48xf32>
    %101 = arith.truncf %100 : vector<4x48xf32> to vector<4x48xbf16>
    %c1_69 = arith.constant 1 : index
    %c0_70 = arith.constant 0 : index
    %c0_71 = arith.constant 0 : index
    %102 = vector.load %arg6[%c1_69, %c0_70, %c0_71] : memref<3x48x16xbf16, #tpu.memory_space<vmem>>, vector<1x48x16xbf16>
    %103 = vector.shape_cast %102 : vector<1x48x16xbf16> to vector<48x16xbf16>
    %cst_72 = arith.constant dense<0.000000e+00> : vector<4x16xf32>
    %104 = tpu.matmul %101, %103, %cst_72 {dimension_numbers = #tpu.dot_dimension_numbers<[1], [0], [0], [1], [0, 0, 1, 1], [], []>} : vector<4x48xbf16>, vector<48x16xbf16>, vector<4x16xf32> -> vector<4x16xf32>
    %105 = arith.addf %99, %104 : vector<4x16xf32>
    %c2_73 = arith.constant 2 : index
    %c0_74 = arith.constant 0 : index
    %106 = vector.load %arg17[%c2_73, %c0_74] : memref<6x48xf32, #tpu.memory_space<vmem>>, vector<4x48xf32>
    %107 = arith.truncf %106 : vector<4x48xf32> to vector<4x48xbf16>
    %c2_75 = arith.constant 2 : index
    %c0_76 = arith.constant 0 : index
    %c0_77 = arith.constant 0 : index
    %108 = vector.load %arg6[%c2_75, %c0_76, %c0_77] : memref<3x48x16xbf16, #tpu.memory_space<vmem>>, vector<1x48x16xbf16>
    %109 = vector.shape_cast %108 : vector<1x48x16xbf16> to vector<48x16xbf16>
    %cst_78 = arith.constant dense<0.000000e+00> : vector<4x16xf32>
    %110 = tpu.matmul %107, %109, %cst_78 {dimension_numbers = #tpu.dot_dimension_numbers<[1], [0], [0], [1], [0, 0, 1, 1], [], []>} : vector<4x48xbf16>, vector<48x16xbf16>, vector<4x16xf32> -> vector<4x16xf32>
    %111 = arith.addf %105, %110 : vector<4x16xf32>
    %112 = vector.extract_strided_slice %111 {offsets = [0, 0], sizes = [4, 8], strides = [1, 1]} : vector<4x16xf32> to vector<4x8xf32>
    %113 = vector.extract_strided_slice %111 {offsets = [0, 8], sizes = [4, 8], strides = [1, 1]} : vector<4x16xf32> to vector<4x8xf32>
    %114 = arith.maximumf %112, %113 : vector<4x8xf32>
    %115 = tpu.iota {dimensions = array<i32: 0>} : vector<2x4xi32>
    %116 = tpu.iota {dimensions = array<i32: 1>} : vector<2x4xi32>
    %c2_i32_79 = arith.constant 2 : i32
    %117 = vector.broadcast %c2_i32_79 : i32 to vector<2x4xi32>
    %118 = arith.muli %117, %115 : vector<2x4xi32>
    %119 = arith.cmpi eq, %116, %118 : vector<2x4xi32>
    %120 = arith.extui %119 : vector<2x4xi1> to vector<2x4xi32>
    %121 = arith.sitofp %120 : vector<2x4xi32> to vector<2x4xf32>
    %c2_i32_80 = arith.constant 2 : i32
    %122 = vector.broadcast %c2_i32_80 : i32 to vector<2x4xi32>
    %123 = arith.muli %122, %115 : vector<2x4xi32>
    %c1_i32_81 = arith.constant 1 : i32
    %124 = vector.broadcast %c1_i32_81 : i32 to vector<2x4xi32>
    %125 = arith.addi %123, %124 : vector<2x4xi32>
    %126 = arith.cmpi eq, %116, %125 : vector<2x4xi32>
    %127 = arith.extui %126 : vector<2x4xi1> to vector<2x4xi32>
    %128 = arith.sitofp %127 : vector<2x4xi32> to vector<2x4xf32>
    %cst_82 = arith.constant dense<0.000000e+00> : vector<2x8xf32>
    %129 = tpu.matmul %121, %114, %cst_82 {dimension_numbers = #tpu.dot_dimension_numbers<[1], [0], [0], [1], [0, 0, 1, 1], [], []>} : vector<2x4xf32>, vector<4x8xf32>, vector<2x8xf32> -> vector<2x8xf32>
    %cst_83 = arith.constant dense<0.000000e+00> : vector<2x8xf32>
    %130 = tpu.matmul %128, %114, %cst_83 {dimension_numbers = #tpu.dot_dimension_numbers<[1], [0], [0], [1], [0, 0, 1, 1], [], []>} : vector<2x4xf32>, vector<4x8xf32>, vector<2x8xf32> -> vector<2x8xf32>
    %131 = arith.maximumf %129, %130 : vector<2x8xf32>
    %c0_84 = arith.constant 0 : index
    %c0_85 = arith.constant 0 : index
    %132 = vector.load %arg7[%c0_84, %c0_85] : memref<1x8xf32, #tpu.memory_space<vmem>>, vector<1x8xf32>
    %133 = vector.broadcast %132 : vector<1x8xf32> to vector<2x8xf32>
    %134 = arith.addf %131, %133 : vector<2x8xf32>
    %cst_86 = arith.constant 0.000000e+00 : f32
    %135 = vector.broadcast %cst_86 : f32 to vector<2x8xf32>
    %136 = arith.maximumf %134, %135 : vector<2x8xf32>
    %cst_87 = arith.constant 0.000000e+00 : f32
    %137 = vector.broadcast %cst_87 : f32 to vector<3x12xf32>
    %c0_88 = arith.constant 0 : index
    %c0_89 = arith.constant 0 : index
    %138 = vector.load %arg18[%c0_88, %c0_89] : memref<3x12xf32, #tpu.memory_space<vmem>>, vector<3x12xf32>
    tpu.vector_store %arg18[%c0_88, %c0_89], %137 {strides = array<i32>} : memref<3x12xf32, #tpu.memory_space<vmem>>, vector<3x12xf32>,
    %c0_90 = arith.constant 0 : index
    %c0_91 = arith.constant 0 : index
    %139 = vector.load %arg18[%c0_90, %c0_91] : memref<3x12xf32, #tpu.memory_space<vmem>>, vector<2x8xf32>
    tpu.vector_store %arg18[%c0_90, %c0_91], %136 {strides = array<i32>} : memref<3x12xf32, #tpu.memory_space<vmem>>, vector<2x8xf32>,
    %c0_92 = arith.constant 0 : index
    %c0_93 = arith.constant 0 : index
    %140 = vector.load %arg18[%c0_92, %c0_93] : memref<3x12xf32, #tpu.memory_space<vmem>>, vector<2x12xf32>
    %141 = arith.truncf %140 : vector<2x12xf32> to vector<2x12xbf16>
    %c1_94 = arith.constant 1 : index
    %c0_95 = arith.constant 0 : index
    %142 = vector.load %arg18[%c1_94, %c0_95] : memref<3x12xf32, #tpu.memory_space<vmem>>, vector<2x12xf32>
    %143 = arith.truncf %142 : vector<2x12xf32> to vector<2x12xbf16>
    %c0_96 = arith.constant 0 : index
    %c0_97 = arith.constant 0 : index
    %c0_98 = arith.constant 0 : index
    %144 = vector.load %arg8[%c0_96, %c0_97, %c0_98] : memref<3x12x32xbf16, #tpu.memory_space<vmem>>, vector<1x12x32xbf16>
    %145 = vector.shape_cast %144 : vector<1x12x32xbf16> to vector<12x32xbf16>
    %cst_99 = arith.constant dense<0.000000e+00> : vector<2x32xf32>
    %146 = tpu.matmul %141, %145, %cst_99 {dimension_numbers = #tpu.dot_dimension_numbers<[1], [0], [0], [1], [0, 0, 1, 1], [], []>} : vector<2x12xbf16>, vector<12x32xbf16>, vector<2x32xf32> -> vector<2x32xf32>
    %c1_100 = arith.constant 1 : index
    %c0_101 = arith.constant 0 : index
    %c0_102 = arith.constant 0 : index
    %147 = vector.load %arg8[%c1_100, %c0_101, %c0_102] : memref<3x12x32xbf16, #tpu.memory_space<vmem>>, vector<1x12x32xbf16>
    %148 = vector.shape_cast %147 : vector<1x12x32xbf16> to vector<12x32xbf16>
    %cst_103 = arith.constant dense<0.000000e+00> : vector<2x32xf32>
    %149 = tpu.matmul %141, %148, %cst_103 {dimension_numbers = #tpu.dot_dimension_numbers<[1], [0], [0], [1], [0, 0, 1, 1], [], []>} : vector<2x12xbf16>, vector<12x32xbf16>, vector<2x32xf32> -> vector<2x32xf32>
    %c2_104 = arith.constant 2 : index
    %c0_105 = arith.constant 0 : index
    %c0_106 = arith.constant 0 : index
    %150 = vector.load %arg8[%c2_104, %c0_105, %c0_106] : memref<3x12x32xbf16, #tpu.memory_space<vmem>>, vector<1x12x32xbf16>
    %151 = vector.shape_cast %150 : vector<1x12x32xbf16> to vector<12x32xbf16>
    %cst_107 = arith.constant dense<0.000000e+00> : vector<2x32xf32>
    %152 = tpu.matmul %143, %151, %cst_107 {dimension_numbers = #tpu.dot_dimension_numbers<[1], [0], [0], [1], [0, 0, 1, 1], [], []>} : vector<2x12xbf16>, vector<12x32xbf16>, vector<2x32xf32> -> vector<2x32xf32>
    %153 = arith.addf %149, %152 : vector<2x32xf32>
    %c0_108 = arith.constant 0 : index
    %c0_109 = arith.constant 0 : index
    %154 = vector.load %arg9[%c0_108, %c0_109] : memref<1x32xf32, #tpu.memory_space<vmem>>, vector<1x32xf32>
    %155 = vector.broadcast %154 : vector<1x32xf32> to vector<2x32xf32>
    %156 = arith.addf %146, %155 : vector<2x32xf32>
    %cst_110 = arith.constant 0.000000e+00 : f32
    %157 = vector.broadcast %cst_110 : f32 to vector<2x32xf32>
    %158 = arith.maximumf %156, %157 : vector<2x32xf32>
    %c0_111 = arith.constant 0 : index
    %c0_112 = arith.constant 0 : index
    %159 = vector.load %arg9[%c0_111, %c0_112] : memref<1x32xf32, #tpu.memory_space<vmem>>, vector<1x32xf32>
    %160 = vector.broadcast %159 : vector<1x32xf32> to vector<2x32xf32>
    %161 = arith.addf %153, %160 : vector<2x32xf32>
    %cst_113 = arith.constant 0.000000e+00 : f32
    %162 = vector.broadcast %cst_113 : f32 to vector<2x32xf32>
    %163 = arith.maximumf %161, %162 : vector<2x32xf32>
    %164 = tpu.iota {dimensions = array<i32: 0>} : vector<4x2xi32>
    %165 = tpu.iota {dimensions = array<i32: 1>} : vector<4x2xi32>
    %c2_i32_114 = arith.constant 2 : i32
    %166 = vector.broadcast %c2_i32_114 : i32 to vector<4x2xi32>
    %167 = arith.muli %166, %165 : vector<4x2xi32>
    %168 = arith.cmpi eq, %164, %167 : vector<4x2xi32>
    %169 = arith.extui %168 : vector<4x2xi1> to vector<4x2xi32>
    %170 = arith.sitofp %169 : vector<4x2xi32> to vector<4x2xf32>
    %c2_i32_115 = arith.constant 2 : i32
    %171 = vector.broadcast %c2_i32_115 : i32 to vector<4x2xi32>
    %172 = arith.muli %171, %165 : vector<4x2xi32>
    %c1_i32_116 = arith.constant 1 : i32
    %173 = vector.broadcast %c1_i32_116 : i32 to vector<4x2xi32>
    %174 = arith.addi %172, %173 : vector<4x2xi32>
    %175 = arith.cmpi eq, %164, %174 : vector<4x2xi32>
    %176 = arith.extui %175 : vector<4x2xi1> to vector<4x2xi32>
    %177 = arith.sitofp %176 : vector<4x2xi32> to vector<4x2xf32>
    %cst_117 = arith.constant dense<0.000000e+00> : vector<4x32xf32>
    %178 = tpu.matmul %170, %158, %cst_117 {dimension_numbers = #tpu.dot_dimension_numbers<[1], [0], [0], [1], [0, 0, 1, 1], [], []>} : vector<4x2xf32>, vector<2x32xf32>, vector<4x32xf32> -> vector<4x32xf32>
    %cst_118 = arith.constant dense<0.000000e+00> : vector<4x32xf32>
    %179 = tpu.matmul %177, %163, %cst_118 {dimension_numbers = #tpu.dot_dimension_numbers<[1], [0], [0], [1], [0, 0, 1, 1], [], []>} : vector<4x2xf32>, vector<2x32xf32>, vector<4x32xf32> -> vector<4x32xf32>
    %180 = arith.addf %178, %179 : vector<4x32xf32>
    %cst_119 = arith.constant 0.000000e+00 : f32
    %181 = vector.broadcast %cst_119 : f32 to vector<5x40xf32>
    %c0_120 = arith.constant 0 : index
    %c0_121 = arith.constant 0 : index
    %182 = vector.load %arg19[%c0_120, %c0_121] : memref<5x40xf32, #tpu.memory_space<vmem>>, vector<5x40xf32>
    tpu.vector_store %arg19[%c0_120, %c0_121], %181 {strides = array<i32>} : memref<5x40xf32, #tpu.memory_space<vmem>>, vector<5x40xf32>,
    %c0_122 = arith.constant 0 : index
    %c0_123 = arith.constant 0 : index
    %183 = vector.load %arg19[%c0_122, %c0_123] : memref<5x40xf32, #tpu.memory_space<vmem>>, vector<4x32xf32>
    tpu.vector_store %arg19[%c0_122, %c0_123], %180 {strides = array<i32>} : memref<5x40xf32, #tpu.memory_space<vmem>>, vector<4x32xf32>,
    %c0_124 = arith.constant 0 : index
    %c0_125 = arith.constant 0 : index
    %184 = vector.load %arg19[%c0_124, %c0_125] : memref<5x40xf32, #tpu.memory_space<vmem>>, vector<4x40xf32>
    %185 = arith.truncf %184 : vector<4x40xf32> to vector<4x40xbf16>
    %c1_126 = arith.constant 1 : index
    %c0_127 = arith.constant 0 : index
    %186 = vector.load %arg19[%c1_126, %c0_127] : memref<5x40xf32, #tpu.memory_space<vmem>>, vector<4x40xf32>
    %187 = arith.truncf %186 : vector<4x40xf32> to vector<4x40xbf16>
    %c0_128 = arith.constant 0 : index
    %c0_129 = arith.constant 0 : index
    %c0_130 = arith.constant 0 : index
    %188 = vector.load %arg10[%c0_128, %c0_129, %c0_130] : memref<3x40x128xbf16, #tpu.memory_space<vmem>>, vector<1x40x128xbf16>
    %189 = vector.shape_cast %188 : vector<1x40x128xbf16> to vector<40x128xbf16>
    %cst_131 = arith.constant dense<0.000000e+00> : vector<4x128xf32>
    %190 = tpu.matmul %185, %189, %cst_131 {dimension_numbers = #tpu.dot_dimension_numbers<[1], [0], [0], [1], [0, 0, 1, 1], [], []>} : vector<4x40xbf16>, vector<40x128xbf16>, vector<4x128xf32> -> vector<4x128xf32>
    %c1_132 = arith.constant 1 : index
    %c0_133 = arith.constant 0 : index
    %c0_134 = arith.constant 0 : index
    %191 = vector.load %arg10[%c1_132, %c0_133, %c0_134] : memref<3x40x128xbf16, #tpu.memory_space<vmem>>, vector<1x40x128xbf16>
    %192 = vector.shape_cast %191 : vector<1x40x128xbf16> to vector<40x128xbf16>
    %cst_135 = arith.constant dense<0.000000e+00> : vector<4x128xf32>
    %193 = tpu.matmul %185, %192, %cst_135 {dimension_numbers = #tpu.dot_dimension_numbers<[1], [0], [0], [1], [0, 0, 1, 1], [], []>} : vector<4x40xbf16>, vector<40x128xbf16>, vector<4x128xf32> -> vector<4x128xf32>
    %c2_136 = arith.constant 2 : index
    %c0_137 = arith.constant 0 : index
    %c0_138 = arith.constant 0 : index
    %194 = vector.load %arg10[%c2_136, %c0_137, %c0_138] : memref<3x40x128xbf16, #tpu.memory_space<vmem>>, vector<1x40x128xbf16>
    %195 = vector.shape_cast %194 : vector<1x40x128xbf16> to vector<40x128xbf16>
    %cst_139 = arith.constant dense<0.000000e+00> : vector<4x128xf32>
    %196 = tpu.matmul %187, %195, %cst_139 {dimension_numbers = #tpu.dot_dimension_numbers<[1], [0], [0], [1], [0, 0, 1, 1], [], []>} : vector<4x40xbf16>, vector<40x128xbf16>, vector<4x128xf32> -> vector<4x128xf32>
    %197 = arith.addf %193, %196 : vector<4x128xf32>
    %c0_140 = arith.constant 0 : index
    %c0_141 = arith.constant 0 : index
    %198 = vector.load %arg11[%c0_140, %c0_141] : memref<1x128xf32, #tpu.memory_space<vmem>>, vector<1x128xf32>
    %199 = vector.broadcast %198 : vector<1x128xf32> to vector<4x128xf32>
    %200 = arith.addf %190, %199 : vector<4x128xf32>
    %cst_142 = arith.constant 0.000000e+00 : f32
    %201 = vector.broadcast %cst_142 : f32 to vector<4x128xf32>
    %202 = arith.maximumf %200, %201 : vector<4x128xf32>
    %c0_143 = arith.constant 0 : index
    %c0_144 = arith.constant 0 : index
    %203 = vector.load %arg11[%c0_143, %c0_144] : memref<1x128xf32, #tpu.memory_space<vmem>>, vector<1x128xf32>
    %204 = vector.broadcast %203 : vector<1x128xf32> to vector<4x128xf32>
    %205 = arith.addf %197, %204 : vector<4x128xf32>
    %cst_145 = arith.constant 0.000000e+00 : f32
    %206 = vector.broadcast %cst_145 : f32 to vector<4x128xf32>
    %207 = arith.maximumf %205, %206 : vector<4x128xf32>
    %208 = tpu.iota {dimensions = array<i32: 0>} : vector<8x4xi32>
    %209 = tpu.iota {dimensions = array<i32: 1>} : vector<8x4xi32>
    %c2_i32_146 = arith.constant 2 : i32
    %210 = vector.broadcast %c2_i32_146 : i32 to vector<8x4xi32>
    %211 = arith.muli %210, %209 : vector<8x4xi32>
    %212 = arith.cmpi eq, %208, %211 : vector<8x4xi32>
    %213 = arith.extui %212 : vector<8x4xi1> to vector<8x4xi32>
    %214 = arith.sitofp %213 : vector<8x4xi32> to vector<8x4xf32>
    %c2_i32_147 = arith.constant 2 : i32
    %215 = vector.broadcast %c2_i32_147 : i32 to vector<8x4xi32>
    %216 = arith.muli %215, %209 : vector<8x4xi32>
    %c1_i32_148 = arith.constant 1 : i32
    %217 = vector.broadcast %c1_i32_148 : i32 to vector<8x4xi32>
    %218 = arith.addi %216, %217 : vector<8x4xi32>
    %219 = arith.cmpi eq, %208, %218 : vector<8x4xi32>
    %220 = arith.extui %219 : vector<8x4xi1> to vector<8x4xi32>
    %221 = arith.sitofp %220 : vector<8x4xi32> to vector<8x4xf32>
    %cst_149 = arith.constant dense<0.000000e+00> : vector<8x128xf32>
    %222 = tpu.matmul %214, %202, %cst_149 {dimension_numbers = #tpu.dot_dimension_numbers<[1], [0], [0], [1], [0, 0, 1, 1], [], []>} : vector<8x4xf32>, vector<4x128xf32>, vector<8x128xf32> -> vector<8x128xf32>
    %cst_150 = arith.constant dense<0.000000e+00> : vector<8x128xf32>
    %223 = tpu.matmul %221, %207, %cst_150 {dimension_numbers = #tpu.dot_dimension_numbers<[1], [0], [0], [1], [0, 0, 1, 1], [], []>} : vector<8x4xf32>, vector<4x128xf32>, vector<8x128xf32> -> vector<8x128xf32>
    %224 = arith.addf %222, %223 : vector<8x128xf32>
    %cst_151 = arith.constant 0.000000e+00 : f32
    %225 = vector.broadcast %cst_151 : f32 to vector<9x144xf32>
    %c0_152 = arith.constant 0 : index
    %c0_153 = arith.constant 0 : index
    %226 = vector.load %arg20[%c0_152, %c0_153] : memref<9x144xf32, #tpu.memory_space<vmem>>, vector<9x144xf32>
    tpu.vector_store %arg20[%c0_152, %c0_153], %225 {strides = array<i32>} : memref<9x144xf32, #tpu.memory_space<vmem>>, vector<9x144xf32>,
    %c0_154 = arith.constant 0 : index
    %c0_155 = arith.constant 0 : index
    %227 = vector.load %arg20[%c0_154, %c0_155] : memref<9x144xf32, #tpu.memory_space<vmem>>, vector<8x128xf32>
    tpu.vector_store %arg20[%c0_154, %c0_155], %224 {strides = array<i32>} : memref<9x144xf32, #tpu.memory_space<vmem>>, vector<8x128xf32>,
    %c0_156 = arith.constant 0 : index
    %c0_157 = arith.constant 0 : index
    %228 = vector.load %arg20[%c0_156, %c0_157] : memref<9x144xf32, #tpu.memory_space<vmem>>, vector<8x144xf32>
    %229 = arith.truncf %228 : vector<8x144xf32> to vector<8x144xbf16>
    %c1_158 = arith.constant 1 : index
    %c0_159 = arith.constant 0 : index
    %230 = vector.load %arg20[%c1_158, %c0_159] : memref<9x144xf32, #tpu.memory_space<vmem>>, vector<8x144xf32>
    %231 = arith.truncf %230 : vector<8x144xf32> to vector<8x144xbf16>
    %c0_160 = arith.constant 0 : index
    %c0_161 = arith.constant 0 : index
    %c0_162 = arith.constant 0 : index
    %232 = vector.load %arg12[%c0_160, %c0_161, %c0_162] : memref<3x144x48xbf16, #tpu.memory_space<vmem>>, vector<1x144x48xbf16>
    %233 = vector.shape_cast %232 : vector<1x144x48xbf16> to vector<144x48xbf16>
    %cst_163 = arith.constant dense<0.000000e+00> : vector<8x48xf32>
    %234 = tpu.matmul %229, %233, %cst_163 {dimension_numbers = #tpu.dot_dimension_numbers<[1], [0], [0], [1], [0, 0, 1, 1], [], []>} : vector<8x144xbf16>, vector<144x48xbf16>, vector<8x48xf32> -> vector<8x48xf32>
    %c1_164 = arith.constant 1 : index
    %c0_165 = arith.constant 0 : index
    %c0_166 = arith.constant 0 : index
    %235 = vector.load %arg12[%c1_164, %c0_165, %c0_166] : memref<3x144x48xbf16, #tpu.memory_space<vmem>>, vector<1x144x48xbf16>
    %236 = vector.shape_cast %235 : vector<1x144x48xbf16> to vector<144x48xbf16>
    %cst_167 = arith.constant dense<0.000000e+00> : vector<8x48xf32>
    %237 = tpu.matmul %229, %236, %cst_167 {dimension_numbers = #tpu.dot_dimension_numbers<[1], [0], [0], [1], [0, 0, 1, 1], [], []>} : vector<8x144xbf16>, vector<144x48xbf16>, vector<8x48xf32> -> vector<8x48xf32>
    %c2_168 = arith.constant 2 : index
    %c0_169 = arith.constant 0 : index
    %c0_170 = arith.constant 0 : index
    %238 = vector.load %arg12[%c2_168, %c0_169, %c0_170] : memref<3x144x48xbf16, #tpu.memory_space<vmem>>, vector<1x144x48xbf16>
    %239 = vector.shape_cast %238 : vector<1x144x48xbf16> to vector<144x48xbf16>
    %cst_171 = arith.constant dense<0.000000e+00> : vector<8x48xf32>
    %240 = tpu.matmul %231, %239, %cst_171 {dimension_numbers = #tpu.dot_dimension_numbers<[1], [0], [0], [1], [0, 0, 1, 1], [], []>} : vector<8x144xbf16>, vector<144x48xbf16>, vector<8x48xf32> -> vector<8x48xf32>
    %241 = arith.addf %237, %240 : vector<8x48xf32>
    %c0_172 = arith.constant 0 : index
    %c0_173 = arith.constant 0 : index
    %242 = vector.load %arg13[%c0_172, %c0_173] : memref<1x48xf32, #tpu.memory_space<vmem>>, vector<1x48xf32>
    %243 = vector.broadcast %242 : vector<1x48xf32> to vector<8x48xf32>
    %244 = arith.addf %234, %243 : vector<8x48xf32>
    %cst_174 = arith.constant 0.000000e+00 : f32
    %245 = vector.broadcast %cst_174 : f32 to vector<8x48xf32>
    %246 = arith.maximumf %244, %245 : vector<8x48xf32>
    %c0_175 = arith.constant 0 : index
    %c0_176 = arith.constant 0 : index
    %247 = vector.load %arg13[%c0_175, %c0_176] : memref<1x48xf32, #tpu.memory_space<vmem>>, vector<1x48xf32>
    %248 = vector.broadcast %247 : vector<1x48xf32> to vector<8x48xf32>
    %249 = arith.addf %241, %248 : vector<8x48xf32>
    %cst_177 = arith.constant 0.000000e+00 : f32
    %250 = vector.broadcast %cst_177 : f32 to vector<8x48xf32>
    %251 = arith.maximumf %249, %250 : vector<8x48xf32>
    %252 = tpu.iota {dimensions = array<i32: 0>} : vector<16x8xi32>
    %253 = tpu.iota {dimensions = array<i32: 1>} : vector<16x8xi32>
    %c2_i32_178 = arith.constant 2 : i32
    %254 = vector.broadcast %c2_i32_178 : i32 to vector<16x8xi32>
    %255 = arith.muli %254, %253 : vector<16x8xi32>
    %256 = arith.cmpi eq, %252, %255 : vector<16x8xi32>
    %257 = arith.extui %256 : vector<16x8xi1> to vector<16x8xi32>
    %258 = arith.sitofp %257 : vector<16x8xi32> to vector<16x8xf32>
    %c2_i32_179 = arith.constant 2 : i32
    %259 = vector.broadcast %c2_i32_179 : i32 to vector<16x8xi32>
    %260 = arith.muli %259, %253 : vector<16x8xi32>
    %c1_i32_180 = arith.constant 1 : i32
    %261 = vector.broadcast %c1_i32_180 : i32 to vector<16x8xi32>
    %262 = arith.addi %260, %261 : vector<16x8xi32>
    %263 = arith.cmpi eq, %252, %262 : vector<16x8xi32>
    %264 = arith.extui %263 : vector<16x8xi1> to vector<16x8xi32>
    %265 = arith.sitofp %264 : vector<16x8xi32> to vector<16x8xf32>
    %cst_181 = arith.constant dense<0.000000e+00> : vector<16x48xf32>
    %266 = tpu.matmul %258, %246, %cst_181 {dimension_numbers = #tpu.dot_dimension_numbers<[1], [0], [0], [1], [0, 0, 1, 1], [], []>} : vector<16x8xf32>, vector<8x48xf32>, vector<16x48xf32> -> vector<16x48xf32>
    %cst_182 = arith.constant dense<0.000000e+00> : vector<16x48xf32>
    %267 = tpu.matmul %265, %251, %cst_182 {dimension_numbers = #tpu.dot_dimension_numbers<[1], [0], [0], [1], [0, 0, 1, 1], [], []>} : vector<16x8xf32>, vector<8x48xf32>, vector<16x48xf32> -> vector<16x48xf32>
    %268 = arith.addf %266, %267 : vector<16x48xf32>
    %c0_183 = arith.constant 0 : index
    %c0_184 = arith.constant 0 : index
    %c0_185 = arith.constant 0 : index
    %269 = vector.load %arg14[%c0_183, %c0_184, %c0_185] : memref<1x16x48xf32, #tpu.memory_space<vmem>>, vector<1x16x48xf32>
    %270 = vector.shape_cast %269 : vector<1x16x48xf32> to vector<16x48xf32>
    %271 = vector.shape_cast %268 : vector<16x48xf32> to vector<1x16x48xf32>
    tpu.vector_store %arg14[%c0_183, %c0_184, %c0_185], %271 {strides = array<i32>} : memref<1x16x48xf32, #tpu.memory_space<vmem>>, vector<1x16x48xf32>,
    return
  }
  func.func @transform_0(%arg0: i32) -> (i32, i32, i32) {
    %c0_i32 = arith.constant 0 : i32
    %c0_i32_0 = arith.constant 0 : i32
    %c0_i32_1 = arith.constant 0 : i32
    return %arg0, %c0_i32, %c0_i32_0 : i32, i32, i32
  }
  func.func @transform_1(%arg0: i32) -> (i32, i32, i32) {
    %c0_i32 = arith.constant 0 : i32
    %c0_i32_0 = arith.constant 0 : i32
    %c0_i32_1 = arith.constant 0 : i32
    %c0_i32_2 = arith.constant 0 : i32
    return %c0_i32, %c0_i32_0, %c0_i32_1 : i32, i32, i32
  }
  func.func @transform_2(%arg0: i32) -> (i32, i32) {
    %c0_i32 = arith.constant 0 : i32
    %c0_i32_0 = arith.constant 0 : i32
    %c0_i32_1 = arith.constant 0 : i32
    return %c0_i32, %c0_i32_0 : i32, i32
  }
  func.func @transform_3(%arg0: i32) -> (i32, i32, i32) {
    %c0_i32 = arith.constant 0 : i32
    %c0_i32_0 = arith.constant 0 : i32
    %c0_i32_1 = arith.constant 0 : i32
    %c0_i32_2 = arith.constant 0 : i32
    return %c0_i32, %c0_i32_0, %c0_i32_1 : i32, i32, i32
  }
  func.func @transform_4(%arg0: i32) -> (i32, i32) {
    %c0_i32 = arith.constant 0 : i32
    %c0_i32_0 = arith.constant 0 : i32
    %c0_i32_1 = arith.constant 0 : i32
    return %c0_i32, %c0_i32_0 : i32, i32
  }
  func.func @transform_5(%arg0: i32) -> (i32, i32, i32) {
    %c0_i32 = arith.constant 0 : i32
    %c0_i32_0 = arith.constant 0 : i32
    %c0_i32_1 = arith.constant 0 : i32
    %c0_i32_2 = arith.constant 0 : i32
    return %c0_i32, %c0_i32_0, %c0_i32_1 : i32, i32, i32
  }
  func.func @transform_6(%arg0: i32) -> (i32, i32) {
    %c0_i32 = arith.constant 0 : i32
    %c0_i32_0 = arith.constant 0 : i32
    %c0_i32_1 = arith.constant 0 : i32
    return %c0_i32, %c0_i32_0 : i32, i32
  }
  func.func @transform_7(%arg0: i32) -> (i32, i32, i32) {
    %c0_i32 = arith.constant 0 : i32
    %c0_i32_0 = arith.constant 0 : i32
    %c0_i32_1 = arith.constant 0 : i32
    %c0_i32_2 = arith.constant 0 : i32
    return %c0_i32, %c0_i32_0, %c0_i32_1 : i32, i32, i32
  }
  func.func @transform_8(%arg0: i32) -> (i32, i32) {
    %c0_i32 = arith.constant 0 : i32
    %c0_i32_0 = arith.constant 0 : i32
    %c0_i32_1 = arith.constant 0 : i32
    return %c0_i32, %c0_i32_0 : i32, i32
  }
  func.func @transform_9(%arg0: i32) -> (i32, i32, i32) {
    %c0_i32 = arith.constant 0 : i32
    %c0_i32_0 = arith.constant 0 : i32
    %c0_i32_1 = arith.constant 0 : i32
    %c0_i32_2 = arith.constant 0 : i32
    return %c0_i32, %c0_i32_0, %c0_i32_1 : i32, i32, i32
  }
  func.func @transform_10(%arg0: i32) -> (i32, i32) {
    %c0_i32 = arith.constant 0 : i32
    %c0_i32_0 = arith.constant 0 : i32
    %c0_i32_1 = arith.constant 0 : i32
    return %c0_i32, %c0_i32_0 : i32, i32
  }
  func.func @transform_11(%arg0: i32) -> (i32, i32, i32) {
    %c0_i32 = arith.constant 0 : i32
    %c0_i32_0 = arith.constant 0 : i32
    %c0_i32_1 = arith.constant 0 : i32
    %c0_i32_2 = arith.constant 0 : i32
    return %c0_i32, %c0_i32_0, %c0_i32_1 : i32, i32, i32
  }
  func.func @transform_12(%arg0: i32) -> (i32, i32) {
    %c0_i32 = arith.constant 0 : i32
    %c0_i32_0 = arith.constant 0 : i32
    %c0_i32_1 = arith.constant 0 : i32
    return %c0_i32, %c0_i32_0 : i32, i32
  }
  func.func @transform_13(%arg0: i32) -> (i32, i32, i32) {
    %c0_i32 = arith.constant 0 : i32
    %c0_i32_0 = arith.constant 0 : i32
    %c0_i32_1 = arith.constant 0 : i32
    return %arg0, %c0_i32, %c0_i32_0 : i32, i32, i32
  }
}

</mosaic_0001>

<bundles_post_ra>
// kernel: autoencoder_forward.1
= control target key start
LH: loop header
LB: loop body
LE: loop exit
PB: predicated region body
PF: predicated region fallthrough
CT: control target
= control target key end

     0   :  { %s3910_s25 = smov 0   ;;  %s4490_s0 = inlined_call_operand.vmem [shape: f32[2,16,48], index: 0, kind: input, shape index: {}]   ;;  %s4491_s1 = inlined_call_operand.vmem [shape: bf16[3,54,256], index: 1, kind: input, shape index: {}]   ;;  %s4492_s2 = inlined_call_operand.vmem [shape: f32[1,128], index: 2, kind: input, shape index: {}]   ;;  %s4493_s3 = inlined_call_operand.vmem [shape: bf16[3,160,64], index: 3, kind: input, shape index: {}]   ;;  %s4494_s4 = inlined_call_operand.vmem [shape: f32[1,32], index: 4, kind: input, shape index: {}]   ;;  %s4495_s5 = inlined_call_operand.vmem [shape: bf16[3,48,16], index: 5, kind: input, shape index: {}]   ;;  %s4496_s6 = inlined_call_operand.vmem [shape: f32[1,8], index: 6, kind: input, shape index: {}]   ;;  %s4497_s7 = inlined_call_operand.vmem [shape: bf16[3,12,32], index: 7, kind: input, shape index: {}]   ;;  %s4498_s8 = inlined_call_operand.vmem [shape: f32[1,32], index: 8, kind: input, shape index: {}]   ;;  %s4499_s9 = inlined_call_operand.vmem [shape: bf16[3,40,128], index: 9, kind: input, shape index: {}]   ;;  %s4500_s10 = inlined_call_operand.vmem [shape: f32[1,128], index: 10, kind: input, shape index: {}]   ;;  %s4501_s11 = inlined_call_operand.vmem [shape: bf16[3,144,48], index: 11, kind: input, shape index: {}]   ;;  %s4502_s12 = inlined_call_operand.vmem [shape: f32[1,48], index: 12, kind: input, shape index: {}]   ;;  %s4503_s13 = inlined_call_operand.vmem [shape: f32[2,16,48], index: 13, kind: output, shape index: {}]  }
   0x1 LB: > { %s3213_s26 = sadd.s32 4294967295, %s3830_s25   ;;  %p3217_p0 = scmp.ge.s32.totalorder %s3830_s25, 1  ;;  %s3830_s25 = sphi %s3910_s25, %s23_s25  }
   0x2   : > { %p387_p1 = scmp.lt.s32.totalorder %s3830_s25, 3 }
   0x4   : > { %p388_p2 = pnand %p3217_p0, %p387_p1 }
   0x5   : > { %p431_p3 = scmp.lt.s32.totalorder (!%p388_p2), %s3213_s26, 1  ;;  %s3834_s15 = smov (!%p388_p2), 3  }
   0x6   : > { %391 = sbr.rel (%p388_p2) target bundleno = 3211 (0xc8b), region = 72  ;;  %s3836_s14 = smov (!%p388_p2), 16  }
   0x7   : > { %s3837_s22 = smov (!%p388_p2), 96   ;;  %s3839_s16 = smov (!%p388_p2), 120  }
   0xb   : > { %v3228_v0 = vld [vmem:[%s4491_s1 + $0x68] sm:$0x77]  ;;  %vm519_vm0 = vcmask 1042432   ;;  %vm444_vm1 = vcmask 441344   ;;  %v469_v3 = vld [vmem:[%s4491_s1 + $0x30] sm:$0x77]  ;;  %v760_v50 = vlaneseq }
   0xc   : > { %v3236_v1 = vcombine.high %v3228_v0, %v3228_v0  ;;  %v3235_v2 = vcombine.low %v3228_v0, %v3228_v0  ;;  %s4505_s26 = smov (!%p431_p3, %s3213_s26), 1  ;;  %v3246_v4 = vcombine.high %v469_v3, %v469_v3  ;;  %v3245_v5 = vcombine.low %v469_v3, %v469_v3  ;;  %v3717_v7 = vld [vmem:[%s4491_s1 + $0x5c] ss:$8 sps:$4 sm:$0xff]   ;;  %v3719_v9 = vld [vmem:[%s4491_s1 + $0x58] ss:$8 sps:$4 sm:$0xff]  }
   0xd   : > { %v3832_v6 = vmov 0.0   ;;  %v3720_v10 = vld [vmem:[%s4491_s1 + $0x24] ss:$8 sps:$4 sm:$0xff]   ;;  %s3495_s20 = sshll.u32 %s4505_s26, 4  ;;  %vm447_vm2 = vcmask 435200   ;;  %v3833_v16 = vmov 0  }
   0xe   : > { %445 = vst.msk [vmem:[#allocation2] sm:$0xff] %vm444_vm1, %v3832_v6  ;;  %446 = vst.msk [vmem:[#allocation2 + $0x8] sm:$0xff] %vm444_vm1, %v3832_v6  ;;  %3237 = vmatprep.subr.msk.bf16.mxu0 %vm519_vm0, %v3236_v1  ;;  %v521_v8 = vsel %vm519_vm0, %v3235_v2, 0  ;;  %3247 = vmatprep.subr.msk.bf16.mxu1 %vm519_vm0, %v3246_v4  ;;  %v608_v11 = vsel %vm519_vm0, %v3245_v5, 0  ;;  %s435_s23 = scalar_lea.vmem %s4490_s0, %s3495_s20  ;;  %v3722_v12 = vld [vmem:[%s4491_s1 + $0x20] ss:$8 sps:$4 sm:$0xff]   ;;  %s440_s21 = scalar_lea.vmem %s4503_s13, %s3495_s20 }
   0xf   : > { %929 = vst [vmem:[#allocation3] sm:$0xff] %v3832_v6  ;;  %932 = vst [vmem:[#allocation3 + $0x10] sm:$0x3] %v3832_v6  ;;  %535 = vmatpush1.bf16.msra.mxu0 %v521_v8  ;;  %622 = vmatpush1.bf16.msra.mxu1 %v608_v11  ;;  %v3723_v13 = vld [vmem:[%s4491_s1 + $0x4c] ss:$8 sps:$4 sm:$0xff]   ;;  %v442_v14 = vld [vmem:[%s435_s23] sm:$0xff] }
  0x10   : > { %2607 = vst [vmem:[#allocation7 + $0x10] sm:$0x1] %v3832_v6  ;;  %536 = vmatprep.subr.bf16.mxu0 %v3717_v7  ;;  %448 = vst.msk [vmem:[#allocation2 + $0x10] sm:$0x3] %vm447_vm2, %v3832_v6  ;;  %623 = vmatprep.subr.bf16.mxu1 %v3720_v10  ;;  %v3726_v15 = vld [vmem:[%s4491_s1 + $0x14] ss:$8 sps:$4 sm:$0xff]  }
  0x11   : > { %558 = vmatprep.mubr.bf16.mxu0 %v3833_v16  ;;  %451 = vrot.lane.b32.xlu0 %v442_v14, %s3834_s15  ;;  %v3725_v17 = vld [vmem:[%s4491_s1 + $0x48] ss:$8 sps:$4 sm:$0xff]   ;;  %v3729_v20 = vld [vmem:[%s4491_s1 + $0x3c] ss:$8 sps:$4 sm:$0xff]   ;;  %v3731_v23 = vld [vmem:[%s4491_s1 + $0x38] ss:$8 sps:$4 sm:$0xff]  }
  0x12   : > { %645 = vmatprep.mubr.bf16.mxu1 %v3833_v16  ;;  %v443_v18 = vld [vmem:[%s435_s23 + $0x8] sm:$0xff]  ;;  %v3728_v19 = vld [vmem:[%s4491_s1 + $0x10] ss:$8 sps:$4 sm:$0xff]   ;;  %v3255_v22 = vld [vmem:[%s4491_s1 + $0xa0] sm:$0x77]  ;;  %vm457_vm3 = vcmask 416792  }
  0x13   : > { %537 = vmatpush1.bf16.msra.mxu0 %v3719_v9  ;;  %624 = vmatpush1.bf16.msra.mxu1 %v3722_v12  ;;  %v3732_v21 = vld [vmem:[%s4491_s1 + $0x4] ss:$8 sps:$4 sm:$0xff]   ;;  %v3262_v24 = vcombine.low %v3255_v22, %v3255_v22  ;;  %v3734_v25 = vld [vmem:[%s4491_s1] ss:$8 sps:$4 sm:$0xff]   ;;  %v3263_v26 = vcombine.high %v3255_v22, %v3255_v22  ;;  %v3739_v36 = vld [vmem:[%s4491_s1 + $0x94] ss:$8 sps:$4 sm:$0xff]  }
  0x14   : > { %538 = vmatprep.subr.bf16.mxu0 %v3723_v13  ;;  %625 = vmatprep.subr.bf16.mxu1 %v3726_v15  ;;  %v3737_v37 = vld [vmem:[%s4491_s1 + $0x90] ss:$8 sps:$4 sm:$0xff]   ;;  %v3742_v38 = vld [vmem:[%s4491_s1 + $0x84] ss:$8 sps:$4 sm:$0xff]   ;;  %v3740_v39 = vld [vmem:[%s4491_s1 + $0x80] ss:$8 sps:$4 sm:$0xff]  }
  0x15   : > { %453 = vrot.lane.b32.xlu0 %v443_v18, %s3834_s15  ;;  %v706_v27 = vsel %vm519_vm0, %v3262_v24, 0  ;;  %v3745_v40 = vld [vmem:[%s4491_s1 + $0x74] ss:$8 sps:$4 sm:$0xff]   ;;  %v3743_v41 = vld [vmem:[%s4491_s1 + $0x70] ss:$8 sps:$4 sm:$0xff]   ;;  %vm3835_vm4 = vmmov 0  }
  0x16   : > { %vm772_vm5 = vcmask 130048   ;;  %v4015_v54 = vshrl.u32 %v760_v50, 7  ;;  %v4017_v58 = vand.u32 127, %v760_v50  ;;  %v3746_v11 = vld [vmem:[%s4493_s3 + $0x38] sm:$0xff]   ;;  %v3748_v12 = vld [vmem:[%s4493_s3 + $0x88] sm:$0xff]   ;;  %vm933_vm8 = vcmask 254976  }
  0x17   : > { %539 = vmatpush1.bf16.msra.mxu0 %v3725_v17  ;;  %626 = vmatpush1.bf16.msra.mxu1 %v3728_v19  ;;  %2606 = vst.msk [vmem:[#allocation7 + $0x8] sm:$0xff] %vm772_vm5, %v3832_v6  ;;  %vm946_vm9 = vcmask 122880   ;;  %v3747_v13 = vld [vmem:[%s4493_s3 + $0x30] sm:$0xff]   ;;  %v3750_v14 = vld [vmem:[%s4493_s3 + $0x80] sm:$0xff]   ;;  %v3749_v15 = vld [vmem:[%s4493_s3 + $0x28] sm:$0xff]   ;;  %vm930_vm10 = vcmask 261120  }
  0x18   : > { %540 = vmatprep.subr.bf16.mxu0 %v3729_v20  ;;  %627 = vmatprep.subr.bf16.mxu1 %v3732_v21  ;;  %v764_v59 = vmul.u32 2, %v4015_v54  ;;  %934 = vst.msk [vmem:[#allocation3 + $0x18] sm:$0x3] %vm933_vm8, %v3832_v6  ;;  %v3752_v17 = vld [vmem:[%s4493_s3 + $0x78] sm:$0xff]   ;;  %v3751_v18 = vld [vmem:[%s4493_s3 + $0x20] sm:$0xff]   ;;  %v3754_v19 = vld [vmem:[%s4493_s3 + $0x70] sm:$0xff]  }
  0x19   : > { %2608 = vst.msk [vmem:[#allocation7 + $0x18] sm:$0x1] %vm946_vm9, %v3832_v6  ;;  %v3753_v20 = vld [vmem:[%s4493_s3 + $0x18] sm:$0xff]   ;;  %v3756_v21 = vld [vmem:[%s4493_s3 + $0x68] sm:$0xff]   ;;  %v3755_v22 = vld [vmem:[%s4493_s3 + $0x10] sm:$0xff]   ;;  %vm940_vm11 = vcmask 1047681  }
  0x1a   : > { %vm765_vm6 = vcmp.eq.s32.totalorder %v4017_v58, %v764_v59  ;;  %v768_v4 = vadd.s32 1, %v764_v59  ;;  %v3757_v24 = vld [vmem:[%s4493_s3 + $0x8] sm:$0xff]   ;;  %931 = vst.msk [vmem:[#allocation3 + $0x8] sm:$0xff] %vm930_vm10, %v3832_v6  ;;  %vm944_vm12 = vcmask 1040512   ;;  %vm942_vm13 = vcmask 130049   ;;  %s3838_s15 = smov 8  }
  0x1b   : > { %541 = vmatpush1.bf16.msra.mxu0 %v3731_v23  ;;  %628 = vmatpush1.bf16.msra.mxu1 %v3734_v25  ;;  %v4022_v9 = vsel %vm765_vm6, 1.0, %v3832_v6  ;;  %v3758_v23 = vld [vmem:[%s4493_s3 + $0x60] sm:$0xff]   ;;  %vm1361_vm14 = vcmask 64512   ;;  %vm1516_vm15 = vcmask 390144   ;;  %vm1743_vm2 = vcmask 1043456  }
  0x1c   : > { %3264 = vmatprep.subr.msk.bf16.mxu0 %vm519_vm0, %v3263_v26  ;;  %3555 = vmatprep.subr.mxu1 %v3832_v6  ;;  %vm769_vm7 = vcmp.eq.s32.totalorder %v4017_v58, %v768_v4  ;;  %v3759_v25 = vld [vmem:[%s4493_s3] sm:$0xff]   ;;  %v3760_v26 = vld [vmem:[%s4493_s3 + $0x58] sm:$0xff]   ;;  %v3768_v4 = vld [vmem:[%s4493_s3 + $0xc8] sm:$0xff]   ;;  %1517 = vst.msk [vmem:[#allocation4] sm:$0x3f] %vm1516_vm15, %v3832_v6  ;;  %vm1522_vm0 = vcmask 322624  }
  0x1d   : > { %v4032_v10 = vsel %vm769_vm7, 1.0, %v3832_v6  ;;  %vm1899_vm6 = vcmask 92160   ;;  %vm1924_vm7 = vcmask 1045504   ;;  %vm1901_vm8 = vcmask 58368  }
  0x1e   : > { %1900 = vst.msk [vmem:[#allocation5] sm:$0x7] %vm1899_vm6, %v3832_v6  ;;  %vm2239_vm15 = vcmask 323584   ;;  %vm2279_vm6 = vcmask 326656  }
  0x1f   : > { %2240 = vst.msk [vmem:[#allocation6] sm:$0x1f] %vm2239_vm15, %v3832_v6 }
  0x83   : > { %v452_v28 = vpop.permute.xlu0 %451 }
  0x84   : > { %458 = vst.msk [vmem:[#allocation2 + $0x1] sm:$0xff] %vm457_vm3, %v452_v28  ;;  %v3761_v28 = vld [vmem:[%s4493_s3 + $0x48] sm:$0xff]  }
  0x87   : > { %v454_v29 = vpop.permute.xlu0 %453 }
  0x88   : > { %459 = vst.msk [vmem:[#allocation2 + $0x9] sm:$0xff] %vm457_vm3, %v454_v29  ;;  %v3762_v29 = vld [vmem:[%s4493_s3 + $0x50] sm:$0xff]   ;;  %vm1740_vm3 = vcmask 31744  }
  0x8b   : > { %v470_v30 = vld [vmem:[#allocation2 + $0x1] sm:$0xff] }
  0x8c   : > { %v460_v32 = vld [vmem:[#allocation2] sm:$0xff] }
  0x8f   : > { %v471_v31 = vld [vmem:[#allocation2 + $0x9] sm:$0xff] }
  0x90   : > { %v461_v33 = vld [vmem:[#allocation2 + $0x8] sm:$0xff]  ;;  %v472_v34 = vpack.c.bf16 %v471_v31, %v470_v30 }
  0x91   : > { %v462_v35 = vpack.c.bf16 %v461_v33, %v460_v32  ;;  %v656_v42 = vld [vmem:[#allocation2 + $0x2] sm:$0xff]  ;;  %v657_v43 = vld [vmem:[#allocation2 + $0xa] sm:$0xff]  ;;  %v3270_v32 = vld [vmem:[%s4492_s2] ss:$0 sm:$0xff] }
  0x92   : > { %3238 = vmatmul.mubr.msk.bf16.vlgmr.msra.gmra.mxu0 %vm444_vm1, %v472_v34  ;;  %v658_v44 = vpack.c.bf16 %v657_v43, %v656_v42  ;;  %v3763_v33 = vld [vmem:[%s4493_s3 + $0x40] sm:$0xff]  }
  0x93   : > { %3248 = vmatmul.mubr.msk.bf16.vlgmr.msra.gmra.mxu1 %vm444_vm1, %v462_v35  ;;  %720 = vmatpush1.bf16.msra.mxu0 %v706_v27  ;;  %v3764_v35 = vld [vmem:[%s4493_s3 + $0x98] sm:$0xff]  }
  0x94   : > { %743 = vmatprep.mubr.bf16.mxu0 %v3833_v16  ;;  %721 = vmatprep.subr.bf16.mxu0 %v3739_v36 }
  0x95   : > { %3559 = vmatprep.mubr.msk.f32.mxu1 %vm3835_vm4, %v3832_v6 }
  0x97   : > { %722 = vmatpush1.bf16.msra.mxu0 %v3737_v37 }
  0x98   : > { %723 = vmatprep.subr.bf16.mxu0 %v3742_v38 }
  0x9b   : > { %724 = vmatpush1.bf16.msra.mxu0 %v3740_v39 }
  0x9c   : > { %725 = vmatprep.subr.bf16.mxu0 %v3745_v40  ;;  %v3765_v40 = vld [vmem:[%s4493_s3 + $0x90] sm:$0xff]  }
  0x9f   : > { %726 = vmatpush1.bf16.msra.mxu0 %v3743_v41 }
  0xa0   : > { %1180 = vmatprep.subr.bf16.mxu0 %v3833_v16 }
  0xa2   : > { %3265 = vmatmul.mubr.msk.bf16.vlgmr.msra.gmra.mxu0 %vm444_vm1, %v658_v44  ;;  %vm1559_vm1 = vcmask 392192  }
  0xa3   : > { %1181 = vmatpush1.bf16.msra.mxu0 %v3746_v11  ;;  %v3772_v11 = vld [vmem:[%s4493_s3 + $0xa8] sm:$0xff]  }
  0xa4   : > { %1182 = vmatprep.subr.bf16.mxu0 %v3833_v16 }
  0xa7   : > { %1183 = vmatpush1.bf16.msra.mxu0 %v3747_v13  ;;  %v3774_v13 = vld [vmem:[%s4493_s3 + $0xe8] sm:$0xff]  }
  0xa8   : > { %1184 = vmatprep.subr.bf16.mxu0 %v3833_v16 }
  0xab   : > { %1185 = vmatpush1.bf16.msra.mxu0 %v3749_v15 }
  0xac   : > { %1186 = vmatprep.subr.bf16.mxu0 %v3833_v16 }
  0xaf   : > { %1187 = vmatpush1.bf16.msra.mxu0 %v3751_v18 }
  0xb0   : > { %1188 = vmatprep.subr.bf16.mxu0 %v3833_v16 }
  0xb3   : > { %1189 = vmatpush1.bf16.msra.mxu0 %v3753_v20 }
  0xb4   : > { %1190 = vmatprep.subr.bf16.mxu0 %v3833_v16 }
  0xb7   : > { %1191 = vmatpush1.bf16.msra.mxu0 %v3755_v22 }
  0xb8   : > { %1192 = vmatprep.subr.bf16.mxu0 %v3833_v16 }
  0xbb   : > { %1193 = vmatpush1.bf16.msra.mxu0 %v3757_v24 }
  0xbc   : > { %1194 = vmatprep.subr.bf16.mxu0 %v3833_v16 }
  0xbf   : > { %1195 = vmatpush1.bf16.msra.mxu0 %v3759_v25 }
  0xc0   : > { %1208 = vmatprep.subr.bf16.mxu0 %v3833_v16 }
  0xc3   : > { %1209 = vmatpush2.bf16.msra.mxu0 %v3761_v28 }
  0xc4   : > { %1210 = vmatprep.subr.bf16.mxu0 %v3833_v16 }
  0xc7   : > { %1211 = vmatpush2.bf16.msra.mxu0 %v3763_v33 }
  0xc8   : > { %3569 = vmatprep.subr.mxu0 %v3832_v6 }
 0x152   : > { %v560_v45 = vpop.f32.mrf.mxu0 }
 0x153   : > { %v647_v46 = vpop.f32.mrf.mxu1 }
 0x154   : > { %v562_v47 = vpop.f32.mrf.mxu0  ;;  %v648_v0 = vadd.f32 %v647_v46, %v560_v45 }
 0x155   : > { %v649_v48 = vpop.f32.mrf.mxu1 }
 0x156   : > { %v564_v49 = vpop.f32.mrf.mxu0  ;;  %v650_v60 = vadd.f32 %v649_v48, %v562_v47 }
 0x157   : > { %v651_v51 = vpop.f32.mrf.mxu1 }
 0x158   : > { %v566_v52 = vpop.f32.mrf.mxu0  ;;  %v652_v61 = vadd.f32 %v651_v51, %v564_v49 }
 0x159   : > { %v653_v55 = vpop.f32.mrf.mxu1 }
 0x15a   : > { %v654_v62 = vadd.f32 %v653_v55, %v566_v52 }
 0x162   : > { %v745_v53 = vpop.f32.mrf.mxu0 }
 0x163   : > { %v754_v5 = vadd.f32 %v745_v53, %v648_v0 }
 0x164   : > { %v747_v56 = vpop.f32.mrf.mxu0 }
 0x165   : > { %v755_v1 = vadd.f32 %v747_v56, %v650_v60 }
 0x166   : > { %v749_v57 = vpop.f32.mrf.mxu0 }
 0x167   : > { %v756_v2 = vadd.f32 %v749_v57, %v652_v61  ;;  %v758_v8 = vmax.f32 %v754_v5, %v755_v1  ;;  %v3766_v1 = vld [vmem:[%s4493_s3 + $0xd8] sm:$0xff]   ;;  %v3769_v5 = vld [vmem:[%s4493_s3 + $0xc0] sm:$0xff]  }
 0x168   : > { %v751_v63 = vpop.f32.mrf.mxu0 }
 0x169   : > { %v757_v3 = vadd.f32 %v751_v63, %v654_v62 }
 0x16b   : > { %v759_v7 = vmax.f32 %v756_v2, %v757_v3  ;;  %v3767_v3 = vld [vmem:[%s4493_s3 + $0xd0] sm:$0xff]  }
 0x16d   : > { %3556 = vmatpush3.msra.mxu1 %v759_v7 }
 0x16e   : > { %3557 = vmatprep.subr.mxu1 %v3832_v6 }
 0x16f   : > { %3558 = vmatpush3.msra.mxu1 %v758_v8 }
 0x170   : > { %3560 = vmatmul.mubr.msk.f32.vlgmr.msra.gmra.mxu1 %vm772_vm5, %v4022_v9  ;;  %3562 = vmatprep.subr.mxu1 %v3832_v6 }
 0x171   : > { %3563 = vmatpush3.msra.mxu1 %v759_v7  ;;  %3566 = vmatprep.mubr.msk.f32.mxu1 %vm3835_vm4, %v3832_v6  ;;  %v3770_v7 = vld [vmem:[%s4493_s3 + $0xb8] sm:$0xff]  }
 0x172   : > { %3564 = vmatprep.subr.mxu1 %v3832_v6 }
 0x173   : > { %3565 = vmatpush3.msra.mxu1 %v758_v8  ;;  %v3771_v8 = vld [vmem:[%s4493_s3 + $0xb0] sm:$0xff]  }
 0x174   : > { %3567 = vmatmul.mubr.msk.f32.vlgmr.msra.gmra.mxu1 %vm772_vm5, %v4032_v10  ;;  %1077 = vmatprep.subr.bf16.mxu1 %v3833_v16 }
 0x175   : > { %1078 = vmatpush1.bf16.msra.mxu1 %v3748_v12  ;;  %v3773_v12 = vld [vmem:[%s4493_s3 + $0xa0] sm:$0xff]  }
 0x176   : > { %1079 = vmatprep.subr.bf16.mxu1 %v3833_v16 }
 0x179   : > { %1080 = vmatpush1.bf16.msra.mxu1 %v3750_v14 }
 0x17a   : > { %1081 = vmatprep.subr.bf16.mxu1 %v3833_v16 }
 0x17d   : > { %1082 = vmatpush1.bf16.msra.mxu1 %v3752_v17  ;;  %v3775_v17 = vld [vmem:[%s4493_s3 + $0xe0] sm:$0xff]  }
 0x17e   : > { %1083 = vmatprep.subr.bf16.mxu1 %v3833_v16 }
 0x181   : > { %1084 = vmatpush1.bf16.msra.mxu1 %v3754_v19 }
 0x182   : > { %1085 = vmatprep.subr.bf16.mxu1 %v3833_v16 }
 0x185   : > { %1086 = vmatpush1.bf16.msra.mxu1 %v3756_v21 }
 0x186   : > { %1087 = vmatprep.subr.bf16.mxu1 %v3833_v16 }
 0x189   : > { %1088 = vmatpush1.bf16.msra.mxu1 %v3758_v23 }
 0x18a   : > { %1089 = vmatprep.subr.bf16.mxu1 %v3833_v16 }
 0x18d   : > { %1090 = vmatpush1.bf16.msra.mxu1 %v3760_v26 }
 0x18e   : > { %1091 = vmatprep.subr.bf16.mxu1 %v3833_v16 }
 0x191   : > { %1092 = vmatpush1.bf16.msra.mxu1 %v3762_v29 }
 0x192   : > { %1105 = vmatprep.subr.bf16.mxu1 %v3833_v16 }
 0x195   : > { %1106 = vmatpush2.bf16.msra.mxu1 %v3764_v35 }
 0x196   : > { %1107 = vmatprep.subr.bf16.mxu1 %v3833_v16 }
 0x199   : > { %1108 = vmatpush2.bf16.msra.mxu1 %v3765_v40 }
 0x19a   : > { %1315 = vmatprep.subr.bf16.mxu1 %v3833_v16 }
 0x230   : > { %v842_v27 = vpop.f32.mrf.mxu1 }
 0x232   : > { %v3561_v30 = vpop.f32.mrf.mxu1 }
 0x234   : > { %v915_v31 = vpop.f32.mrf.mxu1 }
 0x235   : > { %v919_v34 = vmax.f32 %v842_v27, %v915_v31 }
 0x236   : > { %v3568_v36 = vpop.f32.mrf.mxu1 }
 0x237   : > { %v927_v37 = vadd.f32 %v3270_v32, %v919_v34  ;;  %v3776_v36 = vld [vmem:[%s4495_s5 + $0x28] sm:$0xff]  }
 0x239   : > { %v928_v38 = vmax.f32 %v927_v37, 0.0  ;;  %v3777_v37 = vld [vmem:[%s4495_s5 + $0x20] sm:$0xff]  }
 0x23b   : > { %v936_v39 = vrot.slane %v928_v38, 7 }
 0x23d   : > { %937 = vrot.lane.b32.xlu1 %v936_v39, %s3836_s14  ;;  %v3778_v39 = vld [vmem:[%s4495_s5 + $0x18] sm:$0xff]  }
 0x2af   : > { %v938_v41 = vpop.permute.xlu1 %937 }
 0x2b0   : > { %941 = vst.msk [vmem:[#allocation3] sm:$0xfe] %vm940_vm11, %v938_v41  ;;  %vm2089_vm11 = vcmask 1041408  }
 0x2b1   : > { %945 = vst.msk [vmem:[#allocation3 + $0x10] sm:$0x1] %vm944_vm12, %v938_v41  ;;  %vm2085_vm12 = vcmask 15360  }
 0x2b2   : > { %947 = vst.msk [vmem:[#allocation3 + $0x18] sm:$0x1] %vm946_vm9, %v938_v41  ;;  %vm1920_vm9 = vcmask 97280  }
 0x2b3   : > { %943 = vst.msk [vmem:[#allocation3 + $0x8] sm:$0xfe] %vm942_vm13, %v938_v41 }
 0x2b7   : > { %v948_v43 = vld [vmem:[#allocation3] sm:$0xff] }
 0x2b8   : > { %v950_v46 = vpack.c.bf16 %v948_v43, %v948_v43  ;;  %v972_v48 = vld [vmem:[#allocation3] sm:$0xfe]  ;;  %v974_v49 = vld [vmem:[#allocation3 + $0x10] sm:$0x1] }
 0x2b9   : > { %v975_v47 = vld [vmem:[#allocation3 + $0x18] sm:$0x1]  ;;  %v976_v51 = vpack.c.bf16 %v974_v49, %v972_v48  ;;  %v1220_v14 = vld [vmem:[#allocation3] sm:$0xfc]  ;;  %v1222_v15 = vld [vmem:[#allocation3 + $0x10] sm:$0x3] }
 0x2ba   : > { %v949_v42 = vld [vmem:[#allocation3 + $0x8] sm:$0xff]  ;;  %v1223_v53 = vld [vmem:[#allocation3 + $0x18] sm:$0x3]  ;;  %v1224_v18 = vpack.c.bf16 %v1222_v15, %v1220_v14 }
 0x2bb   : > { %v973_v44 = vld [vmem:[#allocation3 + $0x8] sm:$0xfe]  ;;  %v951_v45 = vpack.c.bf16 %v949_v42, %v949_v42  ;;  %v1002_v56 = vshll.u32 %v976_v51, 16  ;;  %v1000_v61 = vshrl.u32 %v976_v51, 16  ;;  %v3346_v42 = vld [vmem:[%s4494_s4] ss:$0 sm:$0xff] }
 0x2bc   : > { %v977_v50 = vpack.c.bf16 %v975_v47, %v973_v44  ;;  %v1221_v52 = vld [vmem:[#allocation3 + $0x8] sm:$0xfc]  ;;  %v1249_v19 = vrot.slane %v1224_v18, 1  ;;  %v3779_v49 = vld [vmem:[%s4495_s5 + $0x10] sm:$0xff]   ;;  %v3780_v51 = vld [vmem:[%s4495_s5 + $0x8] sm:$0xff]  }
 0x2bd   : > { %3312 = vmatprep.mubr.msk.bf16.mxu0 %vm930_vm10, %v951_v45  ;;  %v1225_v57 = vpack.c.bf16 %v1223_v53, %v1221_v52  ;;  %v1004_v62 = vrot.slane %v1002_v56, 1  ;;  %v3781_v52 = vld [vmem:[%s4495_s5] sm:$0xff]  }
 0x2be   : > { %1213 = vmatmul.mubr.bf16.vlgmr.msra.gmra.mxu0 %v950_v46  ;;  %v1009_v55 = vshll.u32 %v977_v50, 16  ;;  %v1007_v59 = vshrl.u32 %v977_v50, 16  ;;  %v3786_v18 = vld [vmem:[%s4497_s7] sm:$0x3f]  }
 0x2bf   : > { %3571 = vmatprep.mubr.msk.f32.mxu0 %vm3835_vm4, %v3832_v6  ;;  %v1005_v0 = vor.u32 %v1004_v62, %v1000_v61  ;;  %v1250_v2 = vrot.slane %v1225_v57, 1  ;;  %v3783_v57 = vld [vmem:[%s4495_s5 + $0x38] sm:$0xff]  }
 0x2c0   : > { %v1011_v60 = vrot.slane %v1009_v55, 1  ;;  %v3782_v55 = vld [vmem:[%s4495_s5 + $0x40] sm:$0xff]  }
 0x2c2   : > { %v1012_v63 = vor.u32 %v1011_v60, %v1007_v59  ;;  %v3784_v59 = vld [vmem:[%s4495_s5 + $0x30] sm:$0xff]  }
 0x2c4   : > { %3301 = vmatprep.mubr.msk.bf16.mxu1 %vm930_vm10, %v1012_v63 }
 0x2c5   : > { %1110 = vmatmul.mubr.bf16.vlgmr.msra.gmra.mxu1 %v1005_v0 }
 0x2c6   : > { %1316 = vmatpush1.bf16.msra.mxu1 %v3766_v1  ;;  %3343 = vmatprep.mubr.msk.bf16.mxu1 %vm930_vm10, %v1250_v2 }
 0x2c7   : > { %1317 = vmatprep.subr.bf16.mxu1 %v3833_v16 }
 0x2ca   : > { %1318 = vmatpush1.bf16.msra.mxu1 %v3767_v3 }
 0x2cb   : > { %1319 = vmatprep.subr.bf16.mxu1 %v3833_v16 }
 0x2ce   : > { %1320 = vmatpush1.bf16.msra.mxu1 %v3768_v4 }
 0x2cf   : > { %1321 = vmatprep.subr.bf16.mxu1 %v3833_v16 }
 0x2d2   : > { %1322 = vmatpush1.bf16.msra.mxu1 %v3769_v5 }
 0x2d3   : > { %1323 = vmatprep.subr.bf16.mxu1 %v3833_v16 }
 0x2d6   : > { %1324 = vmatpush1.bf16.msra.mxu1 %v3770_v7 }
 0x2d7   : > { %1325 = vmatprep.subr.bf16.mxu1 %v3833_v16 }
 0x2da   : > { %1326 = vmatpush1.bf16.msra.mxu1 %v3771_v8 }
 0x2db   : > { %1327 = vmatprep.subr.bf16.mxu1 %v3833_v16 }
 0x2de   : > { %1328 = vmatpush1.bf16.msra.mxu1 %v3772_v11 }
 0x2df   : > { %1329 = vmatprep.subr.bf16.mxu1 %v3833_v16 }
 0x2e2   : > { %1330 = vmatpush1.bf16.msra.mxu1 %v3773_v12 }
 0x2e3   : > { %1343 = vmatprep.subr.bf16.mxu1 %v3833_v16 }
 0x2e6   : > { %1344 = vmatpush2.bf16.msra.mxu1 %v3774_v13 }
 0x2e7   : > { %1345 = vmatprep.subr.bf16.mxu1 %v3833_v16 }
 0x2ea   : > { %1346 = vmatpush2.bf16.msra.mxu1 %v3775_v17 }
 0x2eb   : > { %3609 = vmatprep.subr.mxu1 %v3832_v6 }
 0x2ed   : > { %1348 = vmatmul.mubr.bf16.vlgmr.msra.gmra.mxu1 %v1249_v19 }
 0x2ee   : > { %3611 = vmatprep.mubr.msk.f32.mxu1 %vm3835_vm4, %v3832_v6 }
 0x37e   : > { %v1214_v20 = vpop.f32.mrf.mxu0 }
 0x380   : > { %v1216_v21 = vpop.f32.mrf.mxu0 }
 0x382   : > { %v1217_v22 = vpop.f32.mrf.mxu0 }
 0x384   : > { %v1218_v23 = vpop.f32.mrf.mxu0 }
 0x385   : > { %v1111_v24 = vpop.f32.mrf.mxu1  ;;  %v3375_v23 = vld [vmem:[%s4496_s6] ss:$0 sm:$0xff] }
 0x386   : > { %v1215_v28 = vadd.f32 %v1214_v20, %v1111_v24  ;;  %v2032_v20 = vsel %vm1924_vm7, %v3786_v18, 0  ;;  %v3801_v18 = vld [vmem:[%s4501_s11 + $0xc0] sm:$0xff]  }
 0x387   : > { %v1113_v25 = vpop.f32.mrf.mxu1 }
 0x389   : > { %v1114_v26 = vpop.f32.mrf.mxu1 }
 0x38b   : > { %v1115_v27 = vpop.f32.mrf.mxu1 }
 0x3ad   : > { %v1349_v29 = vpop.f32.mrf.mxu1 }
 0x3ae   : > { %v1355_v30 = vadd.f32 %v1349_v29, %v1215_v28  ;;  %v3787_v28 = vld [vmem:[%s4497_s7 + $0x8] sm:$0x3f]  }
 0x3af   : > { %v1351_v31 = vpop.f32.mrf.mxu1 }
 0x3b0   : > { %1357 = vrot.lane.b32.xlu1 %v1355_v30, %s3837_s22 }
 0x3b1   : > { %v1352_v32 = vpop.f32.mrf.mxu1 }
 0x3b3   : > { %v1353_v33 = vpop.f32.mrf.mxu1 }
 0x3b4   : > { %v1977_v33 = vsel %vm1924_vm7, %v3787_v28, 0 }
 0x422   : > { %v1358_v34 = vpop.permute.xlu1 %1357 }
 0x423   : > { %v1360_v35 = vmax.f32 %v1355_v30, %v1358_v34 }
 0x425   : > { %3570 = vmatpush3.msra.mxu0 %v1360_v35 }
 0x426   : > { %3572 = vmatmul.mubr.msk.f32.vlgmr.msra.gmra.mxu0 %vm1361_vm14, %v4022_v9  ;;  %3574 = vmatprep.subr.mxu0 %v3832_v6 }
 0x427   : > { %3575 = vmatpush3.msra.mxu0 %v1360_v35  ;;  %3576 = vmatprep.mubr.msk.f32.mxu0 %vm3835_vm4, %v3832_v6 }
 0x428   : > { %3579 = vmatprep.subr.bf16.mxu0 %v3832_v6 }
 0x42a   : > { %3577 = vmatmul.mubr.msk.f32.vlgmr.msra.gmra.mxu0 %vm1361_vm14, %v4032_v10 }
 0x42b   : > { %3585 = vmatprep.mubr.msk.bf16.mxu0 %vm3835_vm4, %v3832_v6  ;;  %3580 = vmatpush3.bf16.msra.mxu0 %v3776_v36 }
 0x42c   : > { %3581 = vmatprep.subr.bf16.mxu0 %v3832_v6 }
 0x42f   : > { %3582 = vmatpush3.bf16.msra.mxu0 %v3777_v37 }
 0x430   : > { %3583 = vmatprep.subr.bf16.mxu0 %v3832_v6 }
 0x433   : > { %3584 = vmatpush3.bf16.msra.mxu0 %v3778_v39 }
 0x434   : > { %3589 = vmatprep.subr.bf16.mxu0 %v3832_v6 }
 0x4e6   : > { %v1430_v38 = vpop.f32.mrf.mxu0 }
 0x4e8   : > { %v3573_v40 = vpop.f32.mrf.mxu0 }
 0x4ea   : > { %v1502_v41 = vpop.f32.mrf.mxu0 }
 0x4eb   : > { %v1506_v43 = vmax.f32 %v1430_v38, %v1502_v41  ;;  %v4271_v38 = vmul.u32 2, %v4017_v58 }
 0x4ec   : > { %v3578_v44 = vpop.f32.mrf.mxu0 }
 0x4ed   : > { %v1514_v45 = vadd.f32 %v3346_v42, %v1506_v43  ;;  %v4274_v43 = vadd.s32 1, %v4271_v38  ;;  %v3384_v44 = vld [vmem:[%s4498_s8] ss:$0 sm:$0xff]  ;;  %vm2078_vm13 = vcmp.eq.s32.totalorder %v4015_v54, %v4271_v38 }
 0x4ef   : > { %v1515_v46 = vmax.f32 %v1514_v45, 0.0  ;;  %vm2082_vm10 = vcmp.eq.s32.totalorder %v4015_v54, %v4274_v43 }
 0x4f1   : > { %1519 = vrot.lane.b32.xlu0 %v1515_v46, %s3838_s15 }
 0x563   : > { %v1520_v47 = vpop.permute.xlu0 %1519 }
 0x564   : > { %1523 = vst.msk [vmem:[#allocation4 + $0x1] sm:$0xf] %vm1522_vm0, %v1520_v47  ;;  %vm2241_vm0 = vcmask 257024  }
 0x56b   : > { %v1532_v48 = vld [vmem:[#allocation4 + $0x1] sm:$0xf] }
 0x56c   : > { %v1533_v50 = vpack.c.bf16 %v1532_v48, %v1532_v48  ;;  %v1524_v53 = vld [vmem:[#allocation4] sm:$0xf] }
 0x56d   : > { %v1525_v56 = vpack.c.bf16 %v1524_v53, %v1524_v53  ;;  %v1664_v60 = vld [vmem:[#allocation4 + $0x2] sm:$0xf] }
 0x56e   : > { %3586 = vmatmul.mubr.msk.bf16.vlgmr.msra.gmra.mxu0 %vm1559_vm1, %v1533_v50  ;;  %v1665_v61 = vpack.c.bf16 %v1664_v60, %v1664_v60 }
 0x56f   : > { %3590 = vmatpush3.bf16.msra.mxu0 %v3779_v49  ;;  %3595 = vmatprep.mubr.msk.bf16.mxu0 %vm3835_vm4, %v3832_v6 }
 0x570   : > { %3591 = vmatprep.subr.bf16.mxu0 %v3832_v6 }
 0x573   : > { %3592 = vmatpush3.bf16.msra.mxu0 %v3780_v51  ;;  %v4282_v51 = vsel %vm2082_vm10, 1.0, %v3832_v6 }
 0x574   : > { %3593 = vmatprep.subr.bf16.mxu0 %v3832_v6 }
 0x577   : > { %3594 = vmatpush3.bf16.msra.mxu0 %v3781_v52 }
 0x578   : > { %3599 = vmatprep.subr.bf16.mxu0 %v3832_v6 }
 0x57a   : > { %3596 = vmatmul.mubr.msk.bf16.vlgmr.msra.gmra.mxu0 %vm1559_vm1, %v1525_v56  ;;  %v3788_v56 = vld [vmem:[%s4499_s9 + $0x38] ss:$0 sps:$4 sm:$0xff]  }
 0x57b   : > { %3600 = vmatpush3.bf16.msra.mxu0 %v3782_v55  ;;  %3605 = vmatprep.mubr.msk.bf16.mxu0 %vm3835_vm4, %v3832_v6  ;;  %v4291_v55 = vsel %vm2078_vm13, 1.0, %v3832_v6 }
 0x57c   : > { %3601 = vmatprep.subr.bf16.mxu0 %v3832_v6 }
 0x57f   : > { %3602 = vmatpush3.bf16.msra.mxu0 %v3783_v57  ;;  %v3789_v57 = vld [vmem:[%s4499_s9 + $0x24] ss:$0 sps:$4 sm:$0xff]  }
 0x580   : > { %3603 = vmatprep.subr.bf16.mxu0 %v3832_v6  ;;  %v2345_v60 = vsel %vm1743_vm2, %v3789_v57, 0  ;;  %v2617_v57 = vld [vmem:[#allocation7 + $0x18] sm:$0x1] }
 0x583   : > { %3604 = vmatpush3.bf16.msra.mxu0 %v3784_v59  ;;  %v2284_v59 = vsel %vm1743_vm2, %v3788_v56, 0  ;;  %v2615_v56 = vld [vmem:[#allocation7 + $0x8] sm:$0xfe] }
 0x584   : > { %3619 = vmatprep.subr.bf16.mxu0 %v3832_v6 }
 0x586   : > { %3606 = vmatmul.mubr.msk.bf16.vlgmr.msra.gmra.mxu0 %vm1559_vm1, %v1665_v61  ;;  %v3790_v61 = vld [vmem:[%s4499_s9 + $0x30] sm:$0xff]  }
 0x587   : > { %3621 = vmatprep.mubr.msk.bf16.mxu0 %vm3835_vm4, %v3832_v6 }
 0x62e   : > { %v1597_v62 = vpop.f32.mrf.mxu0 }
 0x630   : > { %v3587_v63 = vpop.f32.mrf.mxu0 }
 0x631   : > { %v3792_v63 = vld [vmem:[%s4499_s9 + $0x28] sm:$0xff]  }
 0x632   : > { %v1600_v0 = vpop.f32.mrf.mxu0 }
 0x633   : > { %v3793_v0 = vld [vmem:[%s4499_s9 + $0x14] sm:$0xff]  }
 0x634   : > { %v3588_v1 = vpop.f32.mrf.mxu0 }
 0x63a   : > { %v1658_v2 = vpop.f32.mrf.mxu0 }
 0x63b   : > { %v1659_v7 = vadd.f32 %v1658_v2, %v1597_v62  ;;  %v3791_v62 = vld [vmem:[%s4499_s9 + $0x1c] sm:$0xff]  }
 0x63c   : > { %v3597_v3 = vpop.f32.mrf.mxu0 }
 0x63e   : > { %v1661_v4 = vpop.f32.mrf.mxu0 }
 0x640   : > { %v3598_v5 = vpop.f32.mrf.mxu0 }
 0x646   : > { %v1728_v8 = vpop.f32.mrf.mxu0 }
 0x647   : > { %v1734_v11 = vadd.f32 %v1728_v8, %v1659_v7  ;;  %v3794_v7 = vld [vmem:[%s4499_s9 + $0x10] ss:$0 sps:$4 sm:$0xff]  }
 0x648   : > { %v3607_v12 = vpop.f32.mrf.mxu0 }
 0x649   : > { %1736 = vrot.lane.b32.xlu1 %v1734_v11, %s3839_s16 }
 0x64a   : > { %v1731_v13 = vpop.f32.mrf.mxu0 }
 0x64c   : > { %v3608_v14 = vpop.f32.mrf.mxu0 }
 0x64d   : > { %v2410_v14 = vsel %vm1743_vm2, %v3794_v7, 0 }
 0x6bb   : > { %v1737_v15 = vpop.permute.xlu1 %1736 }
 0x6bc   : > { %v1739_v17 = vmax.f32 %v1734_v11, %v1737_v15  ;;  %v3795_v15 = vld [vmem:[%s4499_s9 + $0x8] sm:$0xff]  }
 0x6be   : > { %3610 = vmatpush3.msk.msra.mxu1 %vm1743_vm2, %v1739_v17 }
 0x6bf   : > { %3612 = vmatmul.mubr.msk.f32.vlgmr.msra.gmra.mxu1 %vm1740_vm3, %v4022_v9  ;;  %3614 = vmatprep.subr.mxu1 %v3832_v6  ;;  %v3785_v9 = vld [vmem:[%s4497_s7 + $0x10] sm:$0x3f]  }
 0x6c0   : > { %3615 = vmatpush3.msk.msra.mxu1 %vm1743_vm2, %v1739_v17  ;;  %3616 = vmatprep.mubr.msk.f32.mxu1 %vm3835_vm4, %v3832_v6  ;;  %v1926_v19 = vsel %vm1924_vm7, %v3785_v9, 0  ;;  %v3796_v17 = vld [vmem:[%s4499_s9] sm:$0xff]   ;;  %v3799_v9 = vld [vmem:[%s4501_s11 + $0xc8] sm:$0xff]  }
 0x6c1   : > { %3631 = vmatprep.subr.bf16.mxu1 %v3832_v6  ;;  %3620 = vmatpush3.bf16.msra.mxu0 %v1926_v19  ;;  %v3803_v19 = vld [vmem:[%s4501_s11 + $0xb8] sm:$0xff]  }
 0x6c2   : > { %3625 = vmatprep.subr.bf16.mxu0 %v3832_v6 }
 0x6c3   : > { %3617 = vmatmul.mubr.msk.f32.vlgmr.msra.gmra.mxu1 %vm1740_vm3, %v4032_v10 }
 0x6c4   : > { %3633 = vmatprep.mubr.msk.bf16.mxu1 %vm3835_vm4, %v3832_v6  ;;  %3632 = vmatpush3.bf16.msra.mxu1 %v2032_v20  ;;  %v3805_v20 = vld [vmem:[%s4501_s11 + $0xb0] sm:$0xff]  }
 0x6c5   : > { %3647 = vmatprep.subr.bf16.mxu1 %v3832_v6 }
 0x77f   : > { %v1813_v10 = vpop.f32.mrf.mxu1 }
 0x781   : > { %v3613_v21 = vpop.f32.mrf.mxu1 }
 0x783   : > { %v1885_v22 = vpop.f32.mrf.mxu1 }
 0x784   : > { %v1889_v24 = vmax.f32 %v1813_v10, %v1885_v22  ;;  %v3411_v22 = vld [vmem:[%s4500_s10] ss:$0 sm:$0xff] }
 0x785   : > { %v3618_v25 = vpop.f32.mrf.mxu1 }
 0x786   : > { %v1897_v26 = vadd.f32 %v3375_v23, %v1889_v24 }
 0x788   : > { %v1898_v27 = vmax.f32 %v1897_v26, 0.0 }
 0x78a   : > { %1902 = vst.msk [vmem:[#allocation5] sm:$0x3] %vm1901_vm8, %v1898_v27 }
 0x791   : > { %v1905_v29 = vld [vmem:[#allocation5 + $0x1] sm:$0x3] }
 0x792   : > { %v1903_v30 = vld [vmem:[#allocation5] sm:$0x3]  ;;  %v1906_v31 = vpack.c.bf16 %v1905_v29, %v1905_v29 }
 0x793   : > { %v1904_v32 = vpack.c.bf16 %v1903_v30, %v1903_v30 }
 0x794   : > { %3622 = vmatmul.mubr.msk.bf16.vlgmr.msra.gmra.mxu0 %vm1920_vm9, %v1906_v31 }
 0x795   : > { %3634 = vmatmul.mubr.msk.bf16.vlgmr.msra.gmra.mxu1 %vm1920_vm9, %v1904_v32  ;;  %3626 = vmatpush3.bf16.msra.mxu0 %v1977_v33 }
 0x796   : > { %3627 = vmatprep.mubr.msk.bf16.mxu0 %vm3835_vm4, %v3832_v6  ;;  %3637 = vmatprep.subr.mxu0 %v3832_v6 }
 0x797   : > { %3653 = vmatprep.mubr.msk.bf16.mxu1 %vm3835_vm4, %v3832_v6  ;;  %3648 = vmatpush3.bf16.msra.mxu1 %v2284_v59  ;;  %v2619_v59 = vpack.c.bf16 %v2617_v57, %v2615_v56 }
 0x798   : > { %3649 = vmatprep.subr.bf16.mxu1 %v3832_v6 }
 0x79b   : > { %3650 = vmatpush3.bf16.msra.mxu1 %v3790_v61  ;;  %v2684_v61 = vshrl.u32 %v2619_v59, 16 }
 0x79c   : > { %3628 = vmatmul.mubr.msk.bf16.vlgmr.msra.gmra.mxu0 %vm1920_vm9, %v1904_v32  ;;  %3651 = vmatprep.subr.bf16.mxu1 %v3832_v6 }
 0x79d   : > { %3639 = vmatprep.mubr.msk.f32.mxu0 %vm3835_vm4, %v3832_v6 }
 0x79f   : > { %3652 = vmatpush3.bf16.msra.mxu1 %v3792_v63 }
 0x7a0   : > { %3667 = vmatprep.subr.bf16.mxu1 %v3832_v6 }
 0x854   : > { %v1962_v34 = vpop.f32.mrf.mxu0 }
 0x855   : > { %v2068_v35 = vpop.f32.mrf.mxu1 }
 0x856   : > { %v3623_v36 = vpop.f32.mrf.mxu0  ;;  %v2069_v48 = vadd.f32 %v3384_v44, %v2068_v35 }
 0x857   : > { %v3635_v37 = vpop.f32.mrf.mxu1  ;;  %v3797_v36 = vld [vmem:[%s4501_s11 + $0x80] sm:$0xff]  }
 0x858   : > { %v1965_v39 = vpop.f32.mrf.mxu0  ;;  %v2074_v53 = vmax.f32 %v2069_v48, 0.0  ;;  %v3810_v48 = vld [vmem:[%s4501_s11 + $0x48] sm:$0xff]  }
 0x859   : > { %v2071_v40 = vpop.f32.mrf.mxu1 }
 0x85a   : > { %v3624_v41 = vpop.f32.mrf.mxu0  ;;  %v3798_v40 = vld [vmem:[%s4501_s11 + $0x78] sm:$0xff]  }
 0x85b   : > { %v3636_v42 = vpop.f32.mrf.mxu1  ;;  %v3800_v41 = vld [vmem:[%s4501_s11 + $0x70] sm:$0xff]  }
 0x85c   : > { %v2013_v45 = vpop.f32.mrf.mxu0  ;;  %v3802_v42 = vld [vmem:[%s4501_s11 + $0x68] sm:$0xff]  }
 0x85d   : > { %v2014_v46 = vadd.f32 %v2013_v45, %v1962_v34  ;;  %v3806_v45 = vld [vmem:[%s4501_s11 + $0x58] sm:$0xff]  }
 0x85e   : > { %v3629_v47 = vpop.f32.mrf.mxu0 }
 0x85f   : > { %v2075_v58 = vadd.f32 %v3384_v44, %v2014_v46  ;;  %v3804_v44 = vld [vmem:[%s4501_s11 + $0x60] sm:$0xff]   ;;  %v3807_v46 = vld [vmem:[%s4501_s11 + $0xa8] sm:$0xff]   ;;  %v3808_v47 = vld [vmem:[%s4501_s11 + $0x50] sm:$0xff]  }
 0x860   : > { %v2016_v49 = vpop.f32.mrf.mxu0 }
 0x861   : > { %v2076_v50 = vmax.f32 %v2075_v58, 0.0  ;;  %v3812_v58 = vld [vmem:[%s4501_s11 + $0x88] sm:$0xff]   ;;  %v3809_v49 = vld [vmem:[%s4501_s11 + $0xa0] sm:$0xff]  }
 0x862   : > { %v3630_v52 = vpop.f32.mrf.mxu0 }
 0x863   : > { %3638 = vmatpush3.msk.msra.mxu0 %vm2089_vm11, %v2076_v50  ;;  %v2611_v50 = vld [vmem:[#allocation7 + $0x8] sm:$0xff] }
 0x864   : > { %3640 = vmatmul.mubr.msk.f32.vlgmr.msra.gmra.mxu0 %vm2085_vm12, %v4282_v51  ;;  %3642 = vmatprep.subr.mxu0 %v3832_v6  ;;  %v2613_v52 = vpack.c.bf16 %v2611_v50, %v2611_v50 }
 0x865   : > { %3643 = vmatpush3.msk.msra.mxu0 %vm2089_vm11, %v2074_v53  ;;  %3644 = vmatprep.mubr.msk.f32.mxu0 %vm3835_vm4, %v3832_v6  ;;  %v3811_v53 = vld [vmem:[%s4501_s11 + $0x98] sm:$0xff]  }
 0x866   : > { %3657 = vmatprep.subr.bf16.mxu0 %v3832_v6 }
 0x868   : > { %3645 = vmatmul.mubr.msk.f32.vlgmr.msra.gmra.mxu0 %vm2085_vm12, %v4291_v55 }
 0x869   : > { %3663 = vmatprep.mubr.msk.bf16.mxu0 %vm3835_vm4, %v3832_v6  ;;  %3658 = vmatpush3.bf16.msra.mxu0 %v2345_v60  ;;  %v3813_v60 = vld [vmem:[%s4501_s11 + $0x90] sm:$0xff]  }
 0x86a   : > { %3659 = vmatprep.subr.bf16.mxu0 %v3832_v6 }
 0x86d   : > { %3660 = vmatpush3.bf16.msra.mxu0 %v3791_v62  ;;  %v2686_v62 = vshll.u32 %v2619_v59, 16 }
 0x86e   : > { %3661 = vmatprep.subr.bf16.mxu0 %v3832_v6 }
 0x86f   : > { %v2688_v63 = vrot.slane %v2686_v62, 1 }
 0x871   : > { %3662 = vmatpush3.bf16.msra.mxu0 %v3793_v0  ;;  %v3814_v0 = vld [vmem:[%s4501_s11 + $0xd0] sm:$0xff]  }
 0x872   : > { %3677 = vmatprep.subr.mxu0 %v3832_v6 }
 0x924   : > { %v2159_v1 = vpop.f32.mrf.mxu0 }
 0x926   : > { %v3641_v2 = vpop.f32.mrf.mxu0 }
 0x928   : > { %v2235_v3 = vpop.f32.mrf.mxu0 }
 0x929   : > { %v2236_v4 = vadd.f32 %v2235_v3, %v2159_v1  ;;  %v2689_v1 = vor.u32 %v2688_v63, %v2684_v61 }
 0x92a   : > { %v3646_v5 = vpop.f32.mrf.mxu0 }
 0x92b   : > { %2242 = vst.msk [vmem:[#allocation6] sm:$0xf] %vm2241_vm0, %v2236_v4 }
 0x932   : > { %v2245_v8 = vld [vmem:[#allocation6 + $0x1] sm:$0xf] }
 0x933   : > { %v2243_v11 = vld [vmem:[#allocation6] sm:$0xf]  ;;  %v2246_v12 = vpack.c.bf16 %v2245_v8, %v2245_v8 }
 0x934   : > { %v2244_v13 = vpack.c.bf16 %v2243_v11, %v2243_v11  ;;  %v2616_v11 = vld [vmem:[#allocation7 + $0x10] sm:$0x1] }
 0x935   : > { %3654 = vmatmul.mubr.msk.bf16.vlgmr.msra.gmra.mxu1 %vm2279_vm6, %v2246_v12 }
 0x936   : > { %3664 = vmatmul.mubr.msk.bf16.vlgmr.msra.gmra.mxu0 %vm2279_vm6, %v2244_v13  ;;  %3668 = vmatpush3.bf16.msra.mxu1 %v2410_v14 }
 0x937   : > { %3673 = vmatprep.mubr.msk.bf16.mxu1 %vm3835_vm4, %v3832_v6  ;;  %3669 = vmatprep.subr.bf16.mxu1 %v3832_v6 }
 0x938   : > { %3679 = vmatprep.mubr.msk.f32.mxu0 %vm3835_vm4, %v3832_v6 }
 0x93a   : > { %3670 = vmatpush3.bf16.msra.mxu1 %v3795_v15 }
 0x93b   : > { %3671 = vmatprep.subr.bf16.mxu1 %v3832_v6 }
 0x93e   : > { %3672 = vmatpush3.bf16.msra.mxu1 %v3796_v17 }
 0x93f   : > { %2748 = vmatprep.subr.bf16.mxu1 %v3833_v16 }
 0x941   : > { %3674 = vmatmul.mubr.msk.bf16.vlgmr.msra.gmra.mxu1 %vm2279_vm6, %v2244_v13 }
 0x942   : > { %2749 = vmatpush1.bf16.msra.mxu1 %v3799_v9  ;;  %3465 = vmatprep.mubr.msk.bf16.mxu1 %vm772_vm5, %v2689_v1  ;;  %v3815_v9 = vld [vmem:[%s4501_s11 + $0x38] sm:$0xff]  }
 0x943   : > { %2750 = vmatprep.subr.bf16.mxu1 %v3833_v16 }
 0x946   : > { %2751 = vmatpush1.bf16.msra.mxu1 %v3801_v18 }
 0x947   : > { %2752 = vmatprep.subr.bf16.mxu1 %v3833_v16 }
 0x94a   : > { %2753 = vmatpush1.bf16.msra.mxu1 %v3803_v19  ;;  %v3816_v19 = vld [vmem:[%s4501_s11 + $0x30] sm:$0xff]  }
 0x94b   : > { %2754 = vmatprep.subr.bf16.mxu1 %v3833_v16 }
 0x94e   : > { %2755 = vmatpush1.bf16.msra.mxu1 %v3805_v20  ;;  %v3818_v20 = vld [vmem:[%s4501_s11 + $0x20] sm:$0xff]  }
 0x94f   : > { %2756 = vmatprep.subr.bf16.mxu1 %v3833_v16 }
 0x952   : > { %2757 = vmatpush1.bf16.msra.mxu1 %v3807_v46 }
 0x953   : > { %2758 = vmatprep.subr.bf16.mxu1 %v3833_v16 }
 0x956   : > { %2759 = vmatpush1.bf16.msra.mxu1 %v3809_v49 }
 0x957   : > { %2760 = vmatprep.subr.bf16.mxu1 %v3833_v16 }
 0x95a   : > { %2761 = vmatpush1.bf16.msra.mxu1 %v3811_v53 }
 0x95b   : > { %2762 = vmatprep.subr.bf16.mxu1 %v3833_v16 }
 0x95e   : > { %2763 = vmatpush1.bf16.msra.mxu1 %v3813_v60 }
 0x95f   : > { %2778 = vmatprep.subr.bf16.mxu1 %v3833_v16 }
 0x962   : > { %2779 = vmatpush2.bf16.msra.mxu1 %v3814_v0 }
 0x963   : > { %2946 = vmatprep.subr.bf16.mxu1 %v3833_v16 }
 0x9f5   : > { %v2320_v10 = vpop.f32.mrf.mxu1 }
 0x9f6   : > { %v2381_v21 = vpop.f32.mrf.mxu0 }
 0x9f7   : > { %v2382_v23 = vadd.f32 %v2381_v21, %v2320_v10  ;;  %v3655_v24 = vpop.f32.mrf.mxu1  ;;  %v3819_v10 = vld [vmem:[%s4501_s11 + $0x18] sm:$0xff]   ;;  %v3820_v21 = vld [vmem:[%s4501_s11 + $0x10] sm:$0xff]  }
 0x9f8   : > { %v3665_v25 = vpop.f32.mrf.mxu0  ;;  %v3823_v24 = vld [vmem:[%s4501_s11 + $0x40] sm:$0xff]  }
 0x9f9   : > { %v2453_v26 = vadd.f32 %v3411_v22, %v2382_v23  ;;  %v2323_v27 = vpop.f32.mrf.mxu1  ;;  %v3822_v23 = vld [vmem:[%s4501_s11] sm:$0xff]  }
 0x9fa   : > { %v2384_v28 = vpop.f32.mrf.mxu0 }
 0x9fb   : > { %v2454_v29 = vmax.f32 %v2453_v26, 0.0  ;;  %v3656_v30 = vpop.f32.mrf.mxu1 }
 0x9fc   : > { %v3666_v31 = vpop.f32.mrf.mxu0 }
 0x9fd   : > { %3678 = vmatpush3.msk.msra.mxu0 %vm1743_vm2, %v2454_v29  ;;  %v2989_v29 = vadd.s32 8, %v4015_v54  ;;  %v3476_v31 = vld [vmem:[%s4502_s12] ss:$0 sm:$0xff] }
 0x9fe   : > { %3680 = vmatmul.mubr.msk.f32.vlgmr.msra.gmra.mxu0 %vm1740_vm3, %v4282_v51  ;;  %3682 = vmatprep.subr.mxu0 %v3832_v6 }
 0x9ff   : > { %3684 = vmatprep.mubr.msk.f32.mxu0 %vm3835_vm4, %v3832_v6  ;;  %vm2993_vm4 = vcmp.eq.s32.totalorder %v2989_v29, %v4274_v43 }
 0xa01   : > { %v2446_v32 = vpop.f32.mrf.mxu1 }
 0xa02   : > { %v2447_v33 = vadd.f32 %v3411_v22, %v2446_v32  ;;  %v3821_v22 = vld [vmem:[%s4501_s11 + $0x8] sm:$0xff]  }
 0xa03   : > { %v3675_v34 = vpop.f32.mrf.mxu1 }
 0xa04   : > { %v2452_v35 = vmax.f32 %v2447_v33, 0.0 }
 0xa05   : > { %v2449_v37 = vpop.f32.mrf.mxu1 }
 0xa06   : > { %3683 = vmatpush3.msk.msra.mxu0 %vm1743_vm2, %v2452_v35  ;;  %v3488_v37 = vsel %vm2993_vm4, 1.0, %v3832_v6 }
 0xa07   : > { %v3676_v39 = vpop.f32.mrf.mxu1  ;;  %3685 = vmatmul.mubr.msk.f32.vlgmr.msra.gmra.mxu0 %vm1740_vm3, %v4291_v55  ;;  %2845 = vmatprep.subr.bf16.mxu0 %v3833_v16 }
 0xa08   : > { %2846 = vmatpush1.bf16.msra.mxu0 %v3797_v36  ;;  %3475 = vmatprep.mubr.msk.bf16.mxu0 %vm772_vm5, %v2613_v52 }
 0xa09   : > { %2847 = vmatprep.subr.bf16.mxu0 %v3833_v16 }
 0xa0c   : > { %2848 = vmatpush1.bf16.msra.mxu0 %v3798_v40 }
 0xa0d   : > { %2849 = vmatprep.subr.bf16.mxu0 %v3833_v16 }
 0xa10   : > { %2850 = vmatpush1.bf16.msra.mxu0 %v3800_v41 }
 0xa11   : > { %2851 = vmatprep.subr.bf16.mxu0 %v3833_v16 }
 0xa14   : > { %2852 = vmatpush1.bf16.msra.mxu0 %v3802_v42 }
 0xa15   : > { %2853 = vmatprep.subr.bf16.mxu0 %v3833_v16 }
 0xa18   : > { %2854 = vmatpush1.bf16.msra.mxu0 %v3804_v44 }
 0xa19   : > { %2855 = vmatprep.subr.bf16.mxu0 %v3833_v16 }
 0xa1c   : > { %2856 = vmatpush1.bf16.msra.mxu0 %v3806_v45 }
 0xa1d   : > { %2857 = vmatprep.subr.bf16.mxu0 %v3833_v16 }
 0xa20   : > { %2858 = vmatpush1.bf16.msra.mxu0 %v3808_v47 }
 0xa21   : > { %2859 = vmatprep.subr.bf16.mxu0 %v3833_v16 }
 0xa24   : > { %2860 = vmatpush1.bf16.msra.mxu0 %v3810_v48 }
 0xa25   : > { %2875 = vmatprep.subr.bf16.mxu0 %v3833_v16 }
 0xa28   : > { %2876 = vmatpush2.bf16.msra.mxu0 %v3812_v58 }
 0xabe   : > { %v2526_v2 = vpop.f32.mrf.mxu0 }
 0xac0   : > { %v3681_v3 = vpop.f32.mrf.mxu0 }
 0xac7   : > { %v2601_v4 = vpop.f32.mrf.mxu0 }
 0xac8   : > { %v2602_v5 = vadd.f32 %v2601_v4, %v2526_v2 }
 0xac9   : > { %v3686_v7 = vpop.f32.mrf.mxu0 }
 0xaca   : > { %2609 = vst [vmem:[#allocation7] sm:$0xff] %v2602_v5  ;;  %v2612_v8 = vpack.c.bf16 %v2602_v5, %v2602_v5 }
 0xacc   : > { %2878 = vmatmul.mubr.bf16.vlgmr.msra.gmra.mxu0 %v2612_v8 }
 0xacd   : > { %3689 = vmatprep.mubr.msk.f32.mxu0 %vm1361_vm14, %v4282_v51  ;;  %v3817_v51 = vld [vmem:[%s4501_s11 + $0x28] sm:$0xff]  }
 0xad1   : > { %v2614_v12 = vld [vmem:[#allocation7] sm:$0xfe] }
 0xad2   : > { %v2618_v13 = vpack.c.bf16 %v2616_v11, %v2614_v12 }
 0xad4   : > { %v2679_v14 = vshll.u32 %v2618_v13, 16  ;;  %v2677_v15 = vshrl.u32 %v2618_v13, 16 }
 0xad6   : > { %v2681_v17 = vrot.slane %v2679_v14, 1 }
 0xad8   : > { %v2682_v18 = vor.u32 %v2681_v17, %v2677_v15 }
 0xada   : > { %2781 = vmatmul.mubr.bf16.vlgmr.msra.gmra.mxu1 %v2682_v18 }
 0xadb   : > { %2947 = vmatpush1.bf16.msra.mxu1 %v3815_v9  ;;  %3486 = vmatprep.mubr.msk.bf16.mxu1 %vm772_vm5, %v2613_v52  ;;  %vm2990_vm5 = vcmp.eq.s32.totalorder %v2989_v29, %v4271_v38 }
 0xadc   : > { %2948 = vmatprep.subr.bf16.mxu1 %v3833_v16  ;;  %v3487_v42 = vsel %vm2990_vm5, 1.0, %v3832_v6 }
 0xadf   : > { %2949 = vmatpush1.bf16.msra.mxu1 %v3816_v19 }
 0xae0   : > { %2950 = vmatprep.subr.bf16.mxu1 %v3833_v16 }
 0xae3   : > { %2951 = vmatpush1.bf16.msra.mxu1 %v3817_v51 }
 0xae4   : > { %2952 = vmatprep.subr.bf16.mxu1 %v3833_v16 }
 0xae7   : > { %2953 = vmatpush1.bf16.msra.mxu1 %v3818_v20 }
 0xae8   : > { %2954 = vmatprep.subr.bf16.mxu1 %v3833_v16 }
 0xaeb   : > { %2955 = vmatpush1.bf16.msra.mxu1 %v3819_v10 }
 0xaec   : > { %2956 = vmatprep.subr.bf16.mxu1 %v3833_v16 }
 0xaef   : > { %2957 = vmatpush1.bf16.msra.mxu1 %v3820_v21 }
 0xaf0   : > { %2958 = vmatprep.subr.bf16.mxu1 %v3833_v16 }
 0xaf3   : > { %2959 = vmatpush1.bf16.msra.mxu1 %v3821_v22 }
 0xaf4   : > { %2960 = vmatprep.subr.bf16.mxu1 %v3833_v16 }
 0xaf7   : > { %2961 = vmatpush1.bf16.msra.mxu1 %v3822_v23 }
 0xaf8   : > { %2976 = vmatprep.subr.bf16.mxu1 %v3833_v16 }
 0xafb   : > { %2977 = vmatpush2.bf16.msra.mxu1 %v3823_v24 }
 0xafe   : > { %2979 = vmatmul.mubr.bf16.vlgmr.msra.gmra.mxu1 %v2612_v8 }
 0xb8c   : > { %v2879_v25 = vpop.f32.mrf.mxu0 }
 0xb8e   : > { %v2881_v26 = vpop.f32.mrf.mxu0 }
 0xb90   : > { %v2882_v27 = vpop.f32.mrf.mxu0 }
 0xb92   : > { %v2883_v28 = vpop.f32.mrf.mxu0 }
 0xb9a   : > { %v2782_v30 = vpop.f32.mrf.mxu1 }
 0xb9b   : > { %v2880_v32 = vadd.f32 %v2879_v25, %v2782_v30 }
 0xb9c   : > { %v2784_v33 = vpop.f32.mrf.mxu1 }
 0xb9d   : > { %v2987_v34 = vadd.f32 %v3476_v31, %v2880_v32 }
 0xb9e   : > { %v2785_v35 = vpop.f32.mrf.mxu1 }
 0xb9f   : > { %v2988_v16 = vmax.f32 %v2987_v34, 0.0 }
 0xba0   : > { %v2786_v36 = vpop.f32.mrf.mxu1 }
 0xba1   : > { %3687 = vmatprep.subr.mxu0 %v2988_v16 }
 0xba2   : > { %3688 = vmatpush3.msra.mxu0 %v2988_v16 }
 0xba3   : > { %3690 = vmatmul.mubr.msk.f32.vlgmr.msra.gmra.mxu0 %vm1361_vm14, %v3488_v37 }
 0xba4   : > { %3694 = vmatprep.mubr.msk.f32.mxu0 %vm1361_vm14, %v4291_v55 }
 0xbbe   : > { %v2980_v54 = vpop.f32.mrf.mxu1 }
 0xbbf   : > { %v2981_v39 = vadd.f32 %v3476_v31, %v2980_v54 }
 0xbc0   : > { %v2982_v40 = vpop.f32.mrf.mxu1 }
 0xbc1   : > { %v2986_v41 = vmax.f32 %v2981_v39, 0.0 }
 0xbc2   : > { %v2983_v43 = vpop.f32.mrf.mxu1 }
 0xbc3   : > { %3692 = vmatprep.subr.mxu0 %v2986_v41 }
 0xbc4   : > { %v2984_v44 = vpop.f32.mrf.mxu1  ;;  %3693 = vmatpush3.msra.mxu0 %v2986_v41 }
 0xbc5   : > { %3695 = vmatmul.mubr.msk.f32.vlgmr.msra.gmra.mxu0 %vm1361_vm14, %v3487_v42 }
 0xc63   : > { %v3691_v45 = vpop.f32.mrf.mxu0 }
 0xc65   : > { %v3067_v46 = vpop.f32.mrf.mxu0 }
 0xc85   : > { %v3696_v55 = vpop.f32.mrf.mxu0 }
 0xc86   : > { %v3153_v47 = vadd.f32 %v3696_v55, %v3691_v45 }
 0xc87   : > { %v3147_v38 = vpop.f32.mrf.mxu0 }
 0xc88   : > { %3157 = vst.msk [vmem:[%s440_s21 + $0x8] sm:$0xff] %vm1559_vm1, %v3153_v47  ;;  %v3148_v48 = vadd.f32 %v3147_v38, %v3067_v46 }
 0xc8a   : > { %3156 = vst.msk [vmem:[%s440_s21] sm:$0xff] %vm1559_vm1, %v3148_v48 }
 0xc8b PF: > { %s23_s25 = sadd.s32 1, %s3830_s25  }
 0xc8c   : > { %p20_p4 = scmp.ge.s32.totalorder %s23_s25, 4  }
 0xc8e   :  { %22 = sbr.rel (!%p20_p4) target bundleno = 1 (0x1), region = 114 }

</bundles_post_ra>
